<compile_context>
chip_gen: v7x
topology: tpu7x:2x2x1
jax: 0.10.0
libtpu: 0.0.40
codegen_flags: <defaults>
</compile_context>

<pallas_src>
import functools
import math

import jax
import jax.numpy as jnp
from jax.experimental import pallas as pl
from jax.experimental.pallas import tpu as pltpu

# ---------------- model hyper-parameters (small, consistent with the module) -----
B = 2          # batch
S = 8          # sequence length
D = 32         # d_model
H = 4          # number of attention heads
DH = D // H    # head dim
F = 64         # feed-forward hidden dim
NUM_LAYERS = 2
LN_EPS = 1e-5

N = B * S      # flattened token count   (16)
G = B * H      # batch*heads einsum axis (8)


def _layernorm(x, gamma, beta, eps=LN_EPS):
    mu = jnp.mean(x, axis=-1, keepdims=True)
    var = jnp.mean((x - mu) ** 2, axis=-1, keepdims=True)
    return (x - mu) * jax.lax.rsqrt(var + eps) * gamma + beta


def encoder_stack_kernel(x_ref,
                         wq_ref, bq_ref, wk_ref, bk_ref, wv_ref, bv_ref,
                         wo_ref, bo_ref,
                         w1_ref, b1_ref, w2_ref, b2_ref,
                         g1_ref, be1_ref, g2_ref, be2_ref,
                         out_ref, *, num_layers):
    # ---- hoist all weight/bias loads out of the per-layer loop (shared weights) ----
    wq = wq_ref[...]; bq = bq_ref[...]          # (G, D, DH), (G, 1, DH)
    wk = wk_ref[...]; bk = bk_ref[...]
    wv = wv_ref[...]; bv = bv_ref[...]
    wo = wo_ref[...]; bo = bo_ref[...]          # (G, DH, D), (1, D)
    w1 = w1_ref[...]; b1 = b1_ref[...]          # (D, F), (1, F)
    w2 = w2_ref[...]; b2 = b2_ref[...]          # (F, D), (1, D)
    g1 = g1_ref[...]; be1 = be1_ref[...]        # (1, D)
    g2 = g2_ref[...]; be2 = be2_ref[...]        # (1, D)

    scale = 1.0 / math.sqrt(DH)
    x = x_ref[...]                               # (N, D)

    for _ in range(num_layers):                  # static unroll: all layers fused
        # ---- multi-head self-attention, batched over G = B*H on the leading axis ----
        xg = jnp.broadcast_to(x.reshape(B, S, D)[:, None], (B, H, S, D)).reshape(G, S, D)
        q = jnp.einsum('gsd,gde->gse', xg, wq, preferred_element_type=jnp.float32) + bq
        k = jnp.einsum('gsd,gde->gse', xg, wk, preferred_element_type=jnp.float32) + bk
        v = jnp.einsum('gsd,gde->gse', xg, wv, preferred_element_type=jnp.float32) + bv

        s = jnp.einsum('gqe,gke->gqk', q, k, preferred_element_type=jnp.float32) * scale
        s = s - jnp.max(s, axis=-1, keepdims=True)
        p = jnp.exp(s)
        p = p * pl.reciprocal(jnp.sum(p, axis=-1, keepdims=True), approx=True)

        o = jnp.einsum('gqk,gke->gqe', p, v, preferred_element_type=jnp.float32)   # (G,S,DH)
        z = jnp.einsum('gse,ged->gsd', o, wo, preferred_element_type=jnp.float32)  # (G,S,D)
        attn = jnp.sum(z.reshape(B, H, S, D), axis=1).reshape(N, D) + bo           # (N,D)

        y = _layernorm(x + attn, g1, be1)        # post-norm, residual 1

        # ---- feed-forward (single lane-wide 2D matmuls on the whole [N, D] slab) ----
        f = jnp.dot(y, w1, preferred_element_type=jnp.float32) + b1
        f = jnp.maximum(f, 0.0)                  # ReLU
        f = jnp.dot(f, w2, preferred_element_type=jnp.float32) + b2

        x = _layernorm(y + f, g2, be2)           # residual 2

    out_ref[...] = x.astype(out_ref.dtype)


def _full_spec(shape):
    # whole-array block; single grid step
    return pl.BlockSpec(shape, lambda i: (0,) * len(shape))


@functools.partial(jax.jit, static_argnames=("num_layers",))
def custom_encoder_forward(x, params, num_layers=NUM_LAYERS):
    (wq, bq, wk, bk, wv, bv, wo, bo, w1, b1, w2, b2, g1, be1, g2, be2) = params

    # Head-major weight/bias views, replicated over batch -> leading G = B*H axis.
    # Done in the jitted wrapper (plain XLA) so the kernel never lane-splits activations.
    def qkv_heads(w, b):
        w_g = jnp.broadcast_to(w.reshape(D, H, DH).transpose(1, 0, 2)[None],
                               (B, H, D, DH)).reshape(G, D, DH)
        b_g = jnp.broadcast_to(b.reshape(H, DH)[:, None, :][None],
                               (B, H, 1, DH)).reshape(G, 1, DH)
        return w_g, b_g

    wq_g, bq_g = qkv_heads(wq, bq)
    wk_g, bk_g = qkv_heads(wk, bk)
    wv_g, bv_g = qkv_heads(wv, bv)
    wo_g = jnp.broadcast_to(wo.reshape(H, DH, D)[None], (B, H, DH, D)).reshape(G, DH, D)

    x2 = x.reshape(N, D)

    out2 = pl.pallas_call(
        functools.partial(encoder_stack_kernel, num_layers=num_layers),
        out_shape=jax.ShapeDtypeStruct((N, D), jnp.float32),
        grid=(1,),
        in_specs=[
            _full_spec((N, D)),                                   # x (whole slab)
            _full_spec((G, D, DH)), _full_spec((G, 1, DH)),       # Wq, bq (per head)
            _full_spec((G, D, DH)), _full_spec((G, 1, DH)),       # Wk, bk
            _full_spec((G, D, DH)), _full_spec((G, 1, DH)),       # Wv, bv
            _full_spec((G, DH, D)), _full_spec((1, D)),           # Wo (per head), bo
            _full_spec((D, F)), _full_spec((1, F)),               # W1, b1
            _full_spec((F, D)), _full_spec((1, D)),               # W2, b2
            _full_spec((1, D)), _full_spec((1, D)),               # ln1 gamma/beta
            _full_spec((1, D)), _full_spec((1, D)),               # ln2 gamma/beta
        ],
        out_specs=_full_spec((N, D)),
        compiler_params=pltpu.CompilerParams(
            dimension_semantics=("arbitrary",)),
    )(x2, wq_g, bq_g, wk_g, bk_g, wv_g, bv_g, wo_g, bo,
      w1, b1, w2, b2, g1, be1, g2, be2)

    return out2.reshape(B, S, D)


def init_params(key):
    ks = jax.random.split(key, 6)
    scale = 0.1
    wq = scale * jax.random.normal(ks[0], (D, D), jnp.float32)
    wk = scale * jax.random.normal(ks[1], (D, D), jnp.float32)
    wv = scale * jax.random.normal(ks[2], (D, D), jnp.float32)
    wo = scale * jax.random.normal(ks[3], (D, D), jnp.float32)
    w1 = scale * jax.random.normal(ks[4], (D, F), jnp.float32)
    w2 = scale * jax.random.normal(ks[5], (F, D), jnp.float32)
    bq = jnp.zeros((1, D), jnp.float32)
    bk = jnp.zeros((1, D), jnp.float32)
    bv = jnp.zeros((1, D), jnp.float32)
    bo = jnp.zeros((1, D), jnp.float32)
    b1 = jnp.zeros((1, F), jnp.float32)
    b2 = jnp.zeros((1, D), jnp.float32)
    g1 = jnp.ones((1, D), jnp.float32)
    be1 = jnp.zeros((1, D), jnp.float32)
    g2 = jnp.ones((1, D), jnp.float32)
    be2 = jnp.zeros((1, D), jnp.float32)
    return (wq, bq, wk, bk, wv, bv, wo, bo, w1, b1, w2, b2, g1, be1, g2, be2)


if __name__ == "__main__":
    key = jax.random.PRNGKey(0)
    k_x, k_p = jax.random.split(key)
    x = jax.random.normal(k_x, (B, S, D), jnp.float32)
    params = init_params(k_p)

    out = custom_encoder_forward(x, params, num_layers=NUM_LAYERS)
    out = jax.block_until_ready(out)
    assert out.shape == (B, S, D)
    assert jnp.all(jnp.isfinite(out))
    print("KERNEL_OK")
</pallas_src>

<mosaic_0001>
module attributes {stable_mosaic.version = 11 : i64} {
  func.func @encoder_stack_kernel(%arg0: i32, %arg1: memref<16x32xf32, #tpu.memory_space<vmem>>, %arg2: memref<8x32x8xf32, #tpu.memory_space<vmem>>, %arg3: memref<8x1x8xf32, #tpu.memory_space<vmem>>, %arg4: memref<8x32x8xf32, #tpu.memory_space<vmem>>, %arg5: memref<8x1x8xf32, #tpu.memory_space<vmem>>, %arg6: memref<8x32x8xf32, #tpu.memory_space<vmem>>, %arg7: memref<8x1x8xf32, #tpu.memory_space<vmem>>, %arg8: memref<8x8x32xf32, #tpu.memory_space<vmem>>, %arg9: memref<1x32xf32, #tpu.memory_space<vmem>>, %arg10: memref<32x64xf32, #tpu.memory_space<vmem>>, %arg11: memref<1x64xf32, #tpu.memory_space<vmem>>, %arg12: memref<64x32xf32, #tpu.memory_space<vmem>>, %arg13: memref<1x32xf32, #tpu.memory_space<vmem>>, %arg14: memref<1x32xf32, #tpu.memory_space<vmem>>, %arg15: memref<1x32xf32, #tpu.memory_space<vmem>>, %arg16: memref<1x32xf32, #tpu.memory_space<vmem>>, %arg17: memref<1x32xf32, #tpu.memory_space<vmem>>, %arg18: memref<16x32xf32, #tpu.memory_space<vmem>>) attributes {dimension_semantics = [#tpu.dimension_semantics<arbitrary>], iteration_bounds = array<i64: 1>, scalar_prefetch = 0 : i64, scratch_operands = 0 : i64, tpu.core_type = #tpu.core_type<tc>, window_params = [{pipeline_mode = #tpu.pipeline_mode<synchronous>, transform_indices = @transform_0, window_bounds = array<i64: 16, 32>}, {pipeline_mode = #tpu.pipeline_mode<synchronous>, transform_indices = @transform_1, window_bounds = array<i64: 8, 32, 8>}, {pipeline_mode = #tpu.pipeline_mode<synchronous>, transform_indices = @transform_2, window_bounds = array<i64: 8, 1, 8>}, {pipeline_mode = #tpu.pipeline_mode<synchronous>, transform_indices = @transform_3, window_bounds = array<i64: 8, 32, 8>}, {pipeline_mode = #tpu.pipeline_mode<synchronous>, transform_indices = @transform_4, window_bounds = array<i64: 8, 1, 8>}, {pipeline_mode = #tpu.pipeline_mode<synchronous>, transform_indices = @transform_5, window_bounds = array<i64: 8, 32, 8>}, {pipeline_mode = #tpu.pipeline_mode<synchronous>, transform_indices = @transform_6, window_bounds = array<i64: 8, 1, 8>}, {pipeline_mode = #tpu.pipeline_mode<synchronous>, transform_indices = @transform_7, window_bounds = array<i64: 8, 8, 32>}, {pipeline_mode = #tpu.pipeline_mode<synchronous>, transform_indices = @transform_8, window_bounds = array<i64: 1, 32>}, {pipeline_mode = #tpu.pipeline_mode<synchronous>, transform_indices = @transform_9, window_bounds = array<i64: 32, 64>}, {pipeline_mode = #tpu.pipeline_mode<synchronous>, transform_indices = @transform_10, window_bounds = array<i64: 1, 64>}, {pipeline_mode = #tpu.pipeline_mode<synchronous>, transform_indices = @transform_11, window_bounds = array<i64: 64, 32>}, {pipeline_mode = #tpu.pipeline_mode<synchronous>, transform_indices = @transform_12, window_bounds = array<i64: 1, 32>}, {pipeline_mode = #tpu.pipeline_mode<synchronous>, transform_indices = @transform_13, window_bounds = array<i64: 1, 32>}, {pipeline_mode = #tpu.pipeline_mode<synchronous>, transform_indices = @transform_14, window_bounds = array<i64: 1, 32>}, {pipeline_mode = #tpu.pipeline_mode<synchronous>, transform_indices = @transform_15, window_bounds = array<i64: 1, 32>}, {pipeline_mode = #tpu.pipeline_mode<synchronous>, transform_indices = @transform_16, window_bounds = array<i64: 1, 32>}, {pipeline_mode = #tpu.pipeline_mode<synchronous>, transform_indices = @transform_17, window_bounds = array<i64: 16, 32>}]} {
    %c0 = arith.constant 0 : index
    %c0_0 = arith.constant 0 : index
    %c0_1 = arith.constant 0 : index
    %0 = vector.load %arg2[%c0, %c0_0, %c0_1] : memref<8x32x8xf32, #tpu.memory_space<vmem>>, vector<8x32x8xf32>
    %c0_2 = arith.constant 0 : index
    %c0_3 = arith.constant 0 : index
    %c0_4 = arith.constant 0 : index
    %1 = vector.load %arg3[%c0_2, %c0_3, %c0_4] : memref<8x1x8xf32, #tpu.memory_space<vmem>>, vector<8x1x8xf32>
    %c0_5 = arith.constant 0 : index
    %c0_6 = arith.constant 0 : index
    %c0_7 = arith.constant 0 : index
    %2 = vector.load %arg4[%c0_5, %c0_6, %c0_7] : memref<8x32x8xf32, #tpu.memory_space<vmem>>, vector<8x32x8xf32>
    %c0_8 = arith.constant 0 : index
    %c0_9 = arith.constant 0 : index
    %c0_10 = arith.constant 0 : index
    %3 = vector.load %arg5[%c0_8, %c0_9, %c0_10] : memref<8x1x8xf32, #tpu.memory_space<vmem>>, vector<8x1x8xf32>
    %c0_11 = arith.constant 0 : index
    %c0_12 = arith.constant 0 : index
    %c0_13 = arith.constant 0 : index
    %4 = vector.load %arg6[%c0_11, %c0_12, %c0_13] : memref<8x32x8xf32, #tpu.memory_space<vmem>>, vector<8x32x8xf32>
    %c0_14 = arith.constant 0 : index
    %c0_15 = arith.constant 0 : index
    %c0_16 = arith.constant 0 : index
    %5 = vector.load %arg7[%c0_14, %c0_15, %c0_16] : memref<8x1x8xf32, #tpu.memory_space<vmem>>, vector<8x1x8xf32>
    %c0_17 = arith.constant 0 : index
    %c0_18 = arith.constant 0 : index
    %c0_19 = arith.constant 0 : index
    %6 = vector.load %arg8[%c0_17, %c0_18, %c0_19] : memref<8x8x32xf32, #tpu.memory_space<vmem>>, vector<8x8x32xf32>
    %c0_20 = arith.constant 0 : index
    %c0_21 = arith.constant 0 : index
    %7 = vector.load %arg9[%c0_20, %c0_21] : memref<1x32xf32, #tpu.memory_space<vmem>>, vector<1x32xf32>
    %c0_22 = arith.constant 0 : index
    %c0_23 = arith.constant 0 : index
    %8 = vector.load %arg10[%c0_22, %c0_23] : memref<32x64xf32, #tpu.memory_space<vmem>>, vector<32x64xf32>
    %c0_24 = arith.constant 0 : index
    %c0_25 = arith.constant 0 : index
    %9 = vector.load %arg11[%c0_24, %c0_25] : memref<1x64xf32, #tpu.memory_space<vmem>>, vector<1x64xf32>
    %c0_26 = arith.constant 0 : index
    %c0_27 = arith.constant 0 : index
    %10 = vector.load %arg12[%c0_26, %c0_27] : memref<64x32xf32, #tpu.memory_space<vmem>>, vector<64x32xf32>
    %c0_28 = arith.constant 0 : index
    %c0_29 = arith.constant 0 : index
    %11 = vector.load %arg13[%c0_28, %c0_29] : memref<1x32xf32, #tpu.memory_space<vmem>>, vector<1x32xf32>
    %c0_30 = arith.constant 0 : index
    %c0_31 = arith.constant 0 : index
    %12 = vector.load %arg14[%c0_30, %c0_31] : memref<1x32xf32, #tpu.memory_space<vmem>>, vector<1x32xf32>
    %c0_32 = arith.constant 0 : index
    %c0_33 = arith.constant 0 : index
    %13 = vector.load %arg15[%c0_32, %c0_33] : memref<1x32xf32, #tpu.memory_space<vmem>>, vector<1x32xf32>
    %c0_34 = arith.constant 0 : index
    %c0_35 = arith.constant 0 : index
    %14 = vector.load %arg16[%c0_34, %c0_35] : memref<1x32xf32, #tpu.memory_space<vmem>>, vector<1x32xf32>
    %c0_36 = arith.constant 0 : index
    %c0_37 = arith.constant 0 : index
    %15 = vector.load %arg17[%c0_36, %c0_37] : memref<1x32xf32, #tpu.memory_space<vmem>>, vector<1x32xf32>
    %c0_38 = arith.constant 0 : index
    %c0_39 = arith.constant 0 : index
    %16 = vector.load %arg1[%c0_38, %c0_39] : memref<16x32xf32, #tpu.memory_space<vmem>>, vector<16x32xf32>
    %17 = vector.shape_cast %16 : vector<16x32xf32> to vector<2x8x32xf32>
    %18 = vector.shape_cast %17 : vector<2x8x32xf32> to vector<2x1x8x32xf32>
    %19 = vector.shape_cast %18 : vector<2x1x8x32xf32> to vector<2x1x8x32xf32>
    %20 = vector.broadcast %19 : vector<2x1x8x32xf32> to vector<2x4x8x32xf32>
    %21 = vector.shape_cast %20 : vector<2x4x8x32xf32> to vector<8x8x32xf32>
    "tpu.trace_start"() <{level = 10 : i32, message = "gsd,gde->gse"}> : () -> ()
    %cst = arith.constant dense<0.000000e+00> : vector<8x8x8xf32>
    %22 = tpu.matmul %21, %0, %cst {dimension_numbers = #tpu.dot_dimension_numbers<[2], [1], [1], [2], [0, 0, 0, 1, 1, 2], [0], [0]>} : vector<8x8x32xf32>, vector<8x32x8xf32>, vector<8x8x8xf32> -> vector<8x8x8xf32>
    "tpu.trace_stop"() : () -> ()
    %23 = vector.broadcast %1 : vector<8x1x8xf32> to vector<8x8x8xf32>
    %24 = arith.addf %22, %23 : vector<8x8x8xf32>
    "tpu.trace_start"() <{level = 10 : i32, message = "gsd,gde->gse"}> : () -> ()
    %cst_40 = arith.constant dense<0.000000e+00> : vector<8x8x8xf32>
    %25 = tpu.matmul %21, %2, %cst_40 {dimension_numbers = #tpu.dot_dimension_numbers<[2], [1], [1], [2], [0, 0, 0, 1, 1, 2], [0], [0]>} : vector<8x8x32xf32>, vector<8x32x8xf32>, vector<8x8x8xf32> -> vector<8x8x8xf32>
    "tpu.trace_stop"() : () -> ()
    %26 = vector.broadcast %3 : vector<8x1x8xf32> to vector<8x8x8xf32>
    %27 = arith.addf %25, %26 : vector<8x8x8xf32>
    "tpu.trace_start"() <{level = 10 : i32, message = "gsd,gde->gse"}> : () -> ()
    %cst_41 = arith.constant dense<0.000000e+00> : vector<8x8x8xf32>
    %28 = tpu.matmul %21, %4, %cst_41 {dimension_numbers = #tpu.dot_dimension_numbers<[2], [1], [1], [2], [0, 0, 0, 1, 1, 2], [0], [0]>} : vector<8x8x32xf32>, vector<8x32x8xf32>, vector<8x8x8xf32> -> vector<8x8x8xf32>
    "tpu.trace_stop"() : () -> ()
    %29 = vector.broadcast %5 : vector<8x1x8xf32> to vector<8x8x8xf32>
    %30 = arith.addf %28, %29 : vector<8x8x8xf32>
    "tpu.trace_start"() <{level = 10 : i32, message = "gqe,gke->gqk"}> : () -> ()
    %cst_42 = arith.constant dense<0.000000e+00> : vector<8x8x8xf32>
    %31 = tpu.matmul %24, %27, %cst_42 {dimension_numbers = #tpu.dot_dimension_numbers<[2], [2], [1], [1], [0, 0, 0, 1, 1, 1], [0], [0]>} : vector<8x8x8xf32>, vector<8x8x8xf32>, vector<8x8x8xf32> -> vector<8x8x8xf32>
    "tpu.trace_stop"() : () -> ()
    %cst_43 = arith.constant 0.353553385 : f32
    %32 = vector.broadcast %cst_43 : f32 to vector<8x8x8xf32>
    %33 = arith.mulf %31, %32 : vector<8x8x8xf32>
    %cst_44 = arith.constant dense<0xFF800000> : vector<8x8xf32>
    %34 = vector.multi_reduction <maximumf>, %33, %cst_44 [2] : vector<8x8x8xf32> to vector<8x8xf32>
    %35 = vector.shape_cast %34 : vector<8x8xf32> to vector<8x8x1xf32>
    %36 = vector.broadcast %35 : vector<8x8x1xf32> to vector<8x8x8xf32>
    %37 = arith.subf %33, %36 : vector<8x8x8xf32>
    %38 = math.exp %37 : vector<8x8x8xf32>
    %cst_45 = arith.constant dense<0.000000e+00> : vector<8x8xf32>
    %39 = vector.multi_reduction <add>, %38, %cst_45 [2] : vector<8x8x8xf32> to vector<8x8xf32>
    %40 = vector.shape_cast %39 : vector<8x8xf32> to vector<8x8x1xf32>
    %41 = tpu.reciprocal %40 {approx = true} : vector<8x8x1xf32> -> vector<8x8x1xf32>
    %42 = vector.broadcast %41 : vector<8x8x1xf32> to vector<8x8x8xf32>
    %43 = arith.mulf %38, %42 : vector<8x8x8xf32>
    "tpu.trace_start"() <{level = 10 : i32, message = "gqk,gke->gqe"}> : () -> ()
    %cst_46 = arith.constant dense<0.000000e+00> : vector<8x8x8xf32>
    %44 = tpu.matmul %43, %30, %cst_46 {dimension_numbers = #tpu.dot_dimension_numbers<[2], [1], [1], [2], [0, 0, 0, 1, 1, 2], [0], [0]>} : vector<8x8x8xf32>, vector<8x8x8xf32>, vector<8x8x8xf32> -> vector<8x8x8xf32>
    "tpu.trace_stop"() : () -> ()
    "tpu.trace_start"() <{level = 10 : i32, message = "gse,ged->gsd"}> : () -> ()
    %cst_47 = arith.constant dense<0.000000e+00> : vector<8x8x32xf32>
    %45 = tpu.matmul %44, %6, %cst_47 {dimension_numbers = #tpu.dot_dimension_numbers<[2], [1], [1], [2], [0, 0, 0, 1, 1, 2], [0], [0]>} : vector<8x8x8xf32>, vector<8x8x32xf32>, vector<8x8x32xf32> -> vector<8x8x32xf32>
    "tpu.trace_stop"() : () -> ()
    %46 = vector.shape_cast %45 : vector<8x8x32xf32> to vector<2x4x8x32xf32>
    %cst_48 = arith.constant dense<0.000000e+00> : vector<2x8x32xf32>
    %47 = vector.multi_reduction <add>, %46, %cst_48 [1] : vector<2x4x8x32xf32> to vector<2x8x32xf32>
    %48 = vector.shape_cast %47 : vector<2x8x32xf32> to vector<16x32xf32>
    %49 = vector.broadcast %7 : vector<1x32xf32> to vector<16x32xf32>
    %50 = arith.addf %48, %49 : vector<16x32xf32>
    %51 = arith.addf %16, %50 : vector<16x32xf32>
    %cst_49 = arith.constant dense<0.000000e+00> : vector<16xf32>
    %52 = vector.multi_reduction <add>, %51, %cst_49 [1] : vector<16x32xf32> to vector<16xf32>
    %53 = vector.shape_cast %52 : vector<16xf32> to vector<16x1xf32>
    %cst_50 = arith.constant 3.200000e+01 : f32
    %54 = vector.broadcast %cst_50 : f32 to vector<16x1xf32>
    %55 = arith.divf %53, %54 : vector<16x1xf32>
    %56 = vector.broadcast %55 : vector<16x1xf32> to vector<16x32xf32>
    %57 = arith.subf %51, %56 : vector<16x32xf32>
    %58 = arith.mulf %57, %57 : vector<16x32xf32>
    %cst_51 = arith.constant dense<0.000000e+00> : vector<16xf32>
    %59 = vector.multi_reduction <add>, %58, %cst_51 [1] : vector<16x32xf32> to vector<16xf32>
    %60 = vector.shape_cast %59 : vector<16xf32> to vector<16x1xf32>
    %cst_52 = arith.constant 3.200000e+01 : f32
    %61 = vector.broadcast %cst_52 : f32 to vector<16x1xf32>
    %62 = arith.divf %60, %61 : vector<16x1xf32>
    %63 = vector.broadcast %55 : vector<16x1xf32> to vector<16x32xf32>
    %64 = arith.subf %51, %63 : vector<16x32xf32>
    %cst_53 = arith.constant 9.99999974E-6 : f32
    %65 = vector.broadcast %cst_53 : f32 to vector<16x1xf32>
    %66 = arith.addf %62, %65 : vector<16x1xf32>
    %67 = math.rsqrt %66 : vector<16x1xf32>
    %68 = vector.broadcast %67 : vector<16x1xf32> to vector<16x32xf32>
    %69 = arith.mulf %64, %68 : vector<16x32xf32>
    %70 = vector.broadcast %12 : vector<1x32xf32> to vector<16x32xf32>
    %71 = arith.mulf %69, %70 : vector<16x32xf32>
    %72 = vector.broadcast %13 : vector<1x32xf32> to vector<16x32xf32>
    %73 = arith.addf %71, %72 : vector<16x32xf32>
    %cst_54 = arith.constant dense<0.000000e+00> : vector<16x64xf32>
    %74 = tpu.matmul %73, %8, %cst_54 {dimension_numbers = #tpu.dot_dimension_numbers<[1], [0], [0], [1], [0, 0, 1, 1], [], []>} : vector<16x32xf32>, vector<32x64xf32>, vector<16x64xf32> -> vector<16x64xf32>
    %75 = vector.broadcast %9 : vector<1x64xf32> to vector<16x64xf32>
    %76 = arith.addf %74, %75 : vector<16x64xf32>
    %cst_55 = arith.constant 0.000000e+00 : f32
    %77 = vector.broadcast %cst_55 : f32 to vector<16x64xf32>
    %78 = arith.maximumf %76, %77 : vector<16x64xf32>
    %cst_56 = arith.constant dense<0.000000e+00> : vector<16x32xf32>
    %79 = tpu.matmul %78, %10, %cst_56 {dimension_numbers = #tpu.dot_dimension_numbers<[1], [0], [0], [1], [0, 0, 1, 1], [], []>} : vector<16x64xf32>, vector<64x32xf32>, vector<16x32xf32> -> vector<16x32xf32>
    %80 = vector.broadcast %11 : vector<1x32xf32> to vector<16x32xf32>
    %81 = arith.addf %79, %80 : vector<16x32xf32>
    %82 = arith.addf %73, %81 : vector<16x32xf32>
    %cst_57 = arith.constant dense<0.000000e+00> : vector<16xf32>
    %83 = vector.multi_reduction <add>, %82, %cst_57 [1] : vector<16x32xf32> to vector<16xf32>
    %84 = vector.shape_cast %83 : vector<16xf32> to vector<16x1xf32>
    %cst_58 = arith.constant 3.200000e+01 : f32
    %85 = vector.broadcast %cst_58 : f32 to vector<16x1xf32>
    %86 = arith.divf %84, %85 : vector<16x1xf32>
    %87 = vector.broadcast %86 : vector<16x1xf32> to vector<16x32xf32>
    %88 = arith.subf %82, %87 : vector<16x32xf32>
    %89 = arith.mulf %88, %88 : vector<16x32xf32>
    %cst_59 = arith.constant dense<0.000000e+00> : vector<16xf32>
    %90 = vector.multi_reduction <add>, %89, %cst_59 [1] : vector<16x32xf32> to vector<16xf32>
    %91 = vector.shape_cast %90 : vector<16xf32> to vector<16x1xf32>
    %cst_60 = arith.constant 3.200000e+01 : f32
    %92 = vector.broadcast %cst_60 : f32 to vector<16x1xf32>
    %93 = arith.divf %91, %92 : vector<16x1xf32>
    %94 = vector.broadcast %86 : vector<16x1xf32> to vector<16x32xf32>
    %95 = arith.subf %82, %94 : vector<16x32xf32>
    %cst_61 = arith.constant 9.99999974E-6 : f32
    %96 = vector.broadcast %cst_61 : f32 to vector<16x1xf32>
    %97 = arith.addf %93, %96 : vector<16x1xf32>
    %98 = math.rsqrt %97 : vector<16x1xf32>
    %99 = vector.broadcast %98 : vector<16x1xf32> to vector<16x32xf32>
    %100 = arith.mulf %95, %99 : vector<16x32xf32>
    %101 = vector.broadcast %14 : vector<1x32xf32> to vector<16x32xf32>
    %102 = arith.mulf %100, %101 : vector<16x32xf32>
    %103 = vector.broadcast %15 : vector<1x32xf32> to vector<16x32xf32>
    %104 = arith.addf %102, %103 : vector<16x32xf32>
    %105 = vector.shape_cast %104 : vector<16x32xf32> to vector<2x8x32xf32>
    %106 = vector.shape_cast %105 : vector<2x8x32xf32> to vector<2x1x8x32xf32>
    %107 = vector.shape_cast %106 : vector<2x1x8x32xf32> to vector<2x1x8x32xf32>
    %108 = vector.broadcast %107 : vector<2x1x8x32xf32> to vector<2x4x8x32xf32>
    %109 = vector.shape_cast %108 : vector<2x4x8x32xf32> to vector<8x8x32xf32>
    "tpu.trace_start"() <{level = 10 : i32, message = "gsd,gde->gse"}> : () -> ()
    %cst_62 = arith.constant dense<0.000000e+00> : vector<8x8x8xf32>
    %110 = tpu.matmul %109, %0, %cst_62 {dimension_numbers = #tpu.dot_dimension_numbers<[2], [1], [1], [2], [0, 0, 0, 1, 1, 2], [0], [0]>} : vector<8x8x32xf32>, vector<8x32x8xf32>, vector<8x8x8xf32> -> vector<8x8x8xf32>
    "tpu.trace_stop"() : () -> ()
    %111 = vector.broadcast %1 : vector<8x1x8xf32> to vector<8x8x8xf32>
    %112 = arith.addf %110, %111 : vector<8x8x8xf32>
    "tpu.trace_start"() <{level = 10 : i32, message = "gsd,gde->gse"}> : () -> ()
    %cst_63 = arith.constant dense<0.000000e+00> : vector<8x8x8xf32>
    %113 = tpu.matmul %109, %2, %cst_63 {dimension_numbers = #tpu.dot_dimension_numbers<[2], [1], [1], [2], [0, 0, 0, 1, 1, 2], [0], [0]>} : vector<8x8x32xf32>, vector<8x32x8xf32>, vector<8x8x8xf32> -> vector<8x8x8xf32>
    "tpu.trace_stop"() : () -> ()
    %114 = vector.broadcast %3 : vector<8x1x8xf32> to vector<8x8x8xf32>
    %115 = arith.addf %113, %114 : vector<8x8x8xf32>
    "tpu.trace_start"() <{level = 10 : i32, message = "gsd,gde->gse"}> : () -> ()
    %cst_64 = arith.constant dense<0.000000e+00> : vector<8x8x8xf32>
    %116 = tpu.matmul %109, %4, %cst_64 {dimension_numbers = #tpu.dot_dimension_numbers<[2], [1], [1], [2], [0, 0, 0, 1, 1, 2], [0], [0]>} : vector<8x8x32xf32>, vector<8x32x8xf32>, vector<8x8x8xf32> -> vector<8x8x8xf32>
    "tpu.trace_stop"() : () -> ()
    %117 = vector.broadcast %5 : vector<8x1x8xf32> to vector<8x8x8xf32>
    %118 = arith.addf %116, %117 : vector<8x8x8xf32>
    "tpu.trace_start"() <{level = 10 : i32, message = "gqe,gke->gqk"}> : () -> ()
    %cst_65 = arith.constant dense<0.000000e+00> : vector<8x8x8xf32>
    %119 = tpu.matmul %112, %115, %cst_65 {dimension_numbers = #tpu.dot_dimension_numbers<[2], [2], [1], [1], [0, 0, 0, 1, 1, 1], [0], [0]>} : vector<8x8x8xf32>, vector<8x8x8xf32>, vector<8x8x8xf32> -> vector<8x8x8xf32>
    "tpu.trace_stop"() : () -> ()
    %cst_66 = arith.constant 0.353553385 : f32
    %120 = vector.broadcast %cst_66 : f32 to vector<8x8x8xf32>
    %121 = arith.mulf %119, %120 : vector<8x8x8xf32>
    %cst_67 = arith.constant dense<0xFF800000> : vector<8x8xf32>
    %122 = vector.multi_reduction <maximumf>, %121, %cst_67 [2] : vector<8x8x8xf32> to vector<8x8xf32>
    %123 = vector.shape_cast %122 : vector<8x8xf32> to vector<8x8x1xf32>
    %124 = vector.broadcast %123 : vector<8x8x1xf32> to vector<8x8x8xf32>
    %125 = arith.subf %121, %124 : vector<8x8x8xf32>
    %126 = math.exp %125 : vector<8x8x8xf32>
    %cst_68 = arith.constant dense<0.000000e+00> : vector<8x8xf32>
    %127 = vector.multi_reduction <add>, %126, %cst_68 [2] : vector<8x8x8xf32> to vector<8x8xf32>
    %128 = vector.shape_cast %127 : vector<8x8xf32> to vector<8x8x1xf32>
    %129 = tpu.reciprocal %128 {approx = true} : vector<8x8x1xf32> -> vector<8x8x1xf32>
    %130 = vector.broadcast %129 : vector<8x8x1xf32> to vector<8x8x8xf32>
    %131 = arith.mulf %126, %130 : vector<8x8x8xf32>
    "tpu.trace_start"() <{level = 10 : i32, message = "gqk,gke->gqe"}> : () -> ()
    %cst_69 = arith.constant dense<0.000000e+00> : vector<8x8x8xf32>
    %132 = tpu.matmul %131, %118, %cst_69 {dimension_numbers = #tpu.dot_dimension_numbers<[2], [1], [1], [2], [0, 0, 0, 1, 1, 2], [0], [0]>} : vector<8x8x8xf32>, vector<8x8x8xf32>, vector<8x8x8xf32> -> vector<8x8x8xf32>
    "tpu.trace_stop"() : () -> ()
    "tpu.trace_start"() <{level = 10 : i32, message = "gse,ged->gsd"}> : () -> ()
    %cst_70 = arith.constant dense<0.000000e+00> : vector<8x8x32xf32>
    %133 = tpu.matmul %132, %6, %cst_70 {dimension_numbers = #tpu.dot_dimension_numbers<[2], [1], [1], [2], [0, 0, 0, 1, 1, 2], [0], [0]>} : vector<8x8x8xf32>, vector<8x8x32xf32>, vector<8x8x32xf32> -> vector<8x8x32xf32>
    "tpu.trace_stop"() : () -> ()
    %134 = vector.shape_cast %133 : vector<8x8x32xf32> to vector<2x4x8x32xf32>
    %cst_71 = arith.constant dense<0.000000e+00> : vector<2x8x32xf32>
    %135 = vector.multi_reduction <add>, %134, %cst_71 [1] : vector<2x4x8x32xf32> to vector<2x8x32xf32>
    %136 = vector.shape_cast %135 : vector<2x8x32xf32> to vector<16x32xf32>
    %137 = vector.broadcast %7 : vector<1x32xf32> to vector<16x32xf32>
    %138 = arith.addf %136, %137 : vector<16x32xf32>
    %139 = arith.addf %104, %138 : vector<16x32xf32>
    %cst_72 = arith.constant dense<0.000000e+00> : vector<16xf32>
    %140 = vector.multi_reduction <add>, %139, %cst_72 [1] : vector<16x32xf32> to vector<16xf32>
    %141 = vector.shape_cast %140 : vector<16xf32> to vector<16x1xf32>
    %cst_73 = arith.constant 3.200000e+01 : f32
    %142 = vector.broadcast %cst_73 : f32 to vector<16x1xf32>
    %143 = arith.divf %141, %142 : vector<16x1xf32>
    %144 = vector.broadcast %143 : vector<16x1xf32> to vector<16x32xf32>
    %145 = arith.subf %139, %144 : vector<16x32xf32>
    %146 = arith.mulf %145, %145 : vector<16x32xf32>
    %cst_74 = arith.constant dense<0.000000e+00> : vector<16xf32>
    %147 = vector.multi_reduction <add>, %146, %cst_74 [1] : vector<16x32xf32> to vector<16xf32>
    %148 = vector.shape_cast %147 : vector<16xf32> to vector<16x1xf32>
    %cst_75 = arith.constant 3.200000e+01 : f32
    %149 = vector.broadcast %cst_75 : f32 to vector<16x1xf32>
    %150 = arith.divf %148, %149 : vector<16x1xf32>
    %151 = vector.broadcast %143 : vector<16x1xf32> to vector<16x32xf32>
    %152 = arith.subf %139, %151 : vector<16x32xf32>
    %cst_76 = arith.constant 9.99999974E-6 : f32
    %153 = vector.broadcast %cst_76 : f32 to vector<16x1xf32>
    %154 = arith.addf %150, %153 : vector<16x1xf32>
    %155 = math.rsqrt %154 : vector<16x1xf32>
    %156 = vector.broadcast %155 : vector<16x1xf32> to vector<16x32xf32>
    %157 = arith.mulf %152, %156 : vector<16x32xf32>
    %158 = vector.broadcast %12 : vector<1x32xf32> to vector<16x32xf32>
    %159 = arith.mulf %157, %158 : vector<16x32xf32>
    %160 = vector.broadcast %13 : vector<1x32xf32> to vector<16x32xf32>
    %161 = arith.addf %159, %160 : vector<16x32xf32>
    %cst_77 = arith.constant dense<0.000000e+00> : vector<16x64xf32>
    %162 = tpu.matmul %161, %8, %cst_77 {dimension_numbers = #tpu.dot_dimension_numbers<[1], [0], [0], [1], [0, 0, 1, 1], [], []>} : vector<16x32xf32>, vector<32x64xf32>, vector<16x64xf32> -> vector<16x64xf32>
    %163 = vector.broadcast %9 : vector<1x64xf32> to vector<16x64xf32>
    %164 = arith.addf %162, %163 : vector<16x64xf32>
    %cst_78 = arith.constant 0.000000e+00 : f32
    %165 = vector.broadcast %cst_78 : f32 to vector<16x64xf32>
    %166 = arith.maximumf %164, %165 : vector<16x64xf32>
    %cst_79 = arith.constant dense<0.000000e+00> : vector<16x32xf32>
    %167 = tpu.matmul %166, %10, %cst_79 {dimension_numbers = #tpu.dot_dimension_numbers<[1], [0], [0], [1], [0, 0, 1, 1], [], []>} : vector<16x64xf32>, vector<64x32xf32>, vector<16x32xf32> -> vector<16x32xf32>
    %168 = vector.broadcast %11 : vector<1x32xf32> to vector<16x32xf32>
    %169 = arith.addf %167, %168 : vector<16x32xf32>
    %170 = arith.addf %161, %169 : vector<16x32xf32>
    %cst_80 = arith.constant dense<0.000000e+00> : vector<16xf32>
    %171 = vector.multi_reduction <add>, %170, %cst_80 [1] : vector<16x32xf32> to vector<16xf32>
    %172 = vector.shape_cast %171 : vector<16xf32> to vector<16x1xf32>
    %cst_81 = arith.constant 3.200000e+01 : f32
    %173 = vector.broadcast %cst_81 : f32 to vector<16x1xf32>
    %174 = arith.divf %172, %173 : vector<16x1xf32>
    %175 = vector.broadcast %174 : vector<16x1xf32> to vector<16x32xf32>
    %176 = arith.subf %170, %175 : vector<16x32xf32>
    %177 = arith.mulf %176, %176 : vector<16x32xf32>
    %cst_82 = arith.constant dense<0.000000e+00> : vector<16xf32>
    %178 = vector.multi_reduction <add>, %177, %cst_82 [1] : vector<16x32xf32> to vector<16xf32>
    %179 = vector.shape_cast %178 : vector<16xf32> to vector<16x1xf32>
    %cst_83 = arith.constant 3.200000e+01 : f32
    %180 = vector.broadcast %cst_83 : f32 to vector<16x1xf32>
    %181 = arith.divf %179, %180 : vector<16x1xf32>
    %182 = vector.broadcast %174 : vector<16x1xf32> to vector<16x32xf32>
    %183 = arith.subf %170, %182 : vector<16x32xf32>
    %cst_84 = arith.constant 9.99999974E-6 : f32
    %184 = vector.broadcast %cst_84 : f32 to vector<16x1xf32>
    %185 = arith.addf %181, %184 : vector<16x1xf32>
    %186 = math.rsqrt %185 : vector<16x1xf32>
    %187 = vector.broadcast %186 : vector<16x1xf32> to vector<16x32xf32>
    %188 = arith.mulf %183, %187 : vector<16x32xf32>
    %189 = vector.broadcast %14 : vector<1x32xf32> to vector<16x32xf32>
    %190 = arith.mulf %188, %189 : vector<16x32xf32>
    %191 = vector.broadcast %15 : vector<1x32xf32> to vector<16x32xf32>
    %192 = arith.addf %190, %191 : vector<16x32xf32>
    %c0_85 = arith.constant 0 : index
    %c0_86 = arith.constant 0 : index
    %193 = vector.load %arg18[%c0_85, %c0_86] : memref<16x32xf32, #tpu.memory_space<vmem>>, vector<16x32xf32>
    tpu.vector_store %arg18[%c0_85, %c0_86], %192 {strides = array<i32>} : memref<16x32xf32, #tpu.memory_space<vmem>>, vector<16x32xf32>,
    return
  }
  func.func @transform_0(%arg0: i32) -> (i32, i32) {
    %c0_i32 = arith.constant 0 : i32
    %c0_i32_0 = arith.constant 0 : i32
    %c0_i32_1 = arith.constant 0 : i32
    return %c0_i32, %c0_i32_0 : i32, i32
  }
  func.func @transform_1(%arg0: i32) -> (i32, i32, i32) {
    %c0_i32 = arith.constant 0 : i32
    %c0_i32_0 = arith.constant 0 : i32
    %c0_i32_1 = arith.constant 0 : i32
    %c0_i32_2 = arith.constant 0 : i32
    return %c0_i32, %c0_i32_0, %c0_i32_1 : i32, i32, i32
  }
  func.func @transform_2(%arg0: i32) -> (i32, i32, i32) {
    %c0_i32 = arith.constant 0 : i32
    %c0_i32_0 = arith.constant 0 : i32
    %c0_i32_1 = arith.constant 0 : i32
    %c0_i32_2 = arith.constant 0 : i32
    return %c0_i32, %c0_i32_0, %c0_i32_1 : i32, i32, i32
  }
  func.func @transform_3(%arg0: i32) -> (i32, i32, i32) {
    %c0_i32 = arith.constant 0 : i32
    %c0_i32_0 = arith.constant 0 : i32
    %c0_i32_1 = arith.constant 0 : i32
    %c0_i32_2 = arith.constant 0 : i32
    return %c0_i32, %c0_i32_0, %c0_i32_1 : i32, i32, i32
  }
  func.func @transform_4(%arg0: i32) -> (i32, i32, i32) {
    %c0_i32 = arith.constant 0 : i32
    %c0_i32_0 = arith.constant 0 : i32
    %c0_i32_1 = arith.constant 0 : i32
    %c0_i32_2 = arith.constant 0 : i32
    return %c0_i32, %c0_i32_0, %c0_i32_1 : i32, i32, i32
  }
  func.func @transform_5(%arg0: i32) -> (i32, i32, i32) {
    %c0_i32 = arith.constant 0 : i32
    %c0_i32_0 = arith.constant 0 : i32
    %c0_i32_1 = arith.constant 0 : i32
    %c0_i32_2 = arith.constant 0 : i32
    return %c0_i32, %c0_i32_0, %c0_i32_1 : i32, i32, i32
  }
  func.func @transform_6(%arg0: i32) -> (i32, i32, i32) {
    %c0_i32 = arith.constant 0 : i32
    %c0_i32_0 = arith.constant 0 : i32
    %c0_i32_1 = arith.constant 0 : i32
    %c0_i32_2 = arith.constant 0 : i32
    return %c0_i32, %c0_i32_0, %c0_i32_1 : i32, i32, i32
  }
  func.func @transform_7(%arg0: i32) -> (i32, i32, i32) {
    %c0_i32 = arith.constant 0 : i32
    %c0_i32_0 = arith.constant 0 : i32
    %c0_i32_1 = arith.constant 0 : i32
    %c0_i32_2 = arith.constant 0 : i32
    return %c0_i32, %c0_i32_0, %c0_i32_1 : i32, i32, i32
  }
  func.func @transform_8(%arg0: i32) -> (i32, i32) {
    %c0_i32 = arith.constant 0 : i32
    %c0_i32_0 = arith.constant 0 : i32
    %c0_i32_1 = arith.constant 0 : i32
    return %c0_i32, %c0_i32_0 : i32, i32
  }
  func.func @transform_9(%arg0: i32) -> (i32, i32) {
    %c0_i32 = arith.constant 0 : i32
    %c0_i32_0 = arith.constant 0 : i32
    %c0_i32_1 = arith.constant 0 : i32
    return %c0_i32, %c0_i32_0 : i32, i32
  }
  func.func @transform_10(%arg0: i32) -> (i32, i32) {
    %c0_i32 = arith.constant 0 : i32
    %c0_i32_0 = arith.constant 0 : i32
    %c0_i32_1 = arith.constant 0 : i32
    return %c0_i32, %c0_i32_0 : i32, i32
  }
  func.func @transform_11(%arg0: i32) -> (i32, i32) {
    %c0_i32 = arith.constant 0 : i32
    %c0_i32_0 = arith.constant 0 : i32
    %c0_i32_1 = arith.constant 0 : i32
    return %c0_i32, %c0_i32_0 : i32, i32
  }
  func.func @transform_12(%arg0: i32) -> (i32, i32) {
    %c0_i32 = arith.constant 0 : i32
    %c0_i32_0 = arith.constant 0 : i32
    %c0_i32_1 = arith.constant 0 : i32
    return %c0_i32, %c0_i32_0 : i32, i32
  }
  func.func @transform_13(%arg0: i32) -> (i32, i32) {
    %c0_i32 = arith.constant 0 : i32
    %c0_i32_0 = arith.constant 0 : i32
    %c0_i32_1 = arith.constant 0 : i32
    return %c0_i32, %c0_i32_0 : i32, i32
  }
  func.func @transform_14(%arg0: i32) -> (i32, i32) {
    %c0_i32 = arith.constant 0 : i32
    %c0_i32_0 = arith.constant 0 : i32
    %c0_i32_1 = arith.constant 0 : i32
    return %c0_i32, %c0_i32_0 : i32, i32
  }
  func.func @transform_15(%arg0: i32) -> (i32, i32) {
    %c0_i32 = arith.constant 0 : i32
    %c0_i32_0 = arith.constant 0 : i32
    %c0_i32_1 = arith.constant 0 : i32
    return %c0_i32, %c0_i32_0 : i32, i32
  }
  func.func @transform_16(%arg0: i32) -> (i32, i32) {
    %c0_i32 = arith.constant 0 : i32
    %c0_i32_0 = arith.constant 0 : i32
    %c0_i32_1 = arith.constant 0 : i32
    return %c0_i32, %c0_i32_0 : i32, i32
  }
  func.func @transform_17(%arg0: i32) -> (i32, i32) {
    %c0_i32 = arith.constant 0 : i32
    %c0_i32_0 = arith.constant 0 : i32
    %c0_i32_1 = arith.constant 0 : i32
    return %c0_i32, %c0_i32_0 : i32, i32
  }
}

</mosaic_0001>

<bundles_post_ra>
// kernel: custom_encoder_forward.1
= control target key start
LH: loop header
LB: loop body
LE: loop exit
PB: predicated region body
PF: predicated region fallthrough
CT: control target
= control target key end

     0   :  { %s11418_s0 = inlined_call_operand.vmem [shape: f32[16,32], index: 0, kind: input, shape index: {}]   ;;  %s11419_s1 = inlined_call_operand.vmem [shape: f32[8,32,8], index: 1, kind: input, shape index: {}]   ;;  %s11420_s2 = inlined_call_operand.vmem [shape: f32[8,1,8], index: 2, kind: input, shape index: {}]   ;;  %s11421_s3 = inlined_call_operand.vmem [shape: f32[8,32,8], index: 3, kind: input, shape index: {}]   ;;  %s11422_s4 = inlined_call_operand.vmem [shape: f32[8,1,8], index: 4, kind: input, shape index: {}]   ;;  %s11423_s5 = inlined_call_operand.vmem [shape: f32[8,32,8], index: 5, kind: input, shape index: {}]   ;;  %s11424_s6 = inlined_call_operand.vmem [shape: f32[8,1,8], index: 6, kind: input, shape index: {}]   ;;  %s11425_s7 = inlined_call_operand.vmem [shape: f32[8,8,32], index: 7, kind: input, shape index: {}]   ;;  %s11426_s8 = inlined_call_operand.vmem [shape: f32[1,32], index: 8, kind: input, shape index: {}]   ;;  %s11427_s9 = inlined_call_operand.vmem [shape: f32[32,64], index: 9, kind: input, shape index: {}]   ;;  %s11428_s10 = inlined_call_operand.vmem [shape: f32[1,64], index: 10, kind: input, shape index: {}]   ;;  %s11429_s11 = inlined_call_operand.vmem [shape: f32[64,32], index: 11, kind: input, shape index: {}]   ;;  %s11430_s12 = inlined_call_operand.vmem [shape: f32[1,32], index: 12, kind: input, shape index: {}]   ;;  %s11431_s13 = inlined_call_operand.vmem [shape: f32[1,32], index: 13, kind: input, shape index: {}]   ;;  %s11432_s14 = inlined_call_operand.vmem [shape: f32[1,32], index: 14, kind: input, shape index: {}]   ;;  %s11433_s15 = inlined_call_operand.vmem [shape: f32[1,32], index: 15, kind: input, shape index: {}]   ;;  %s11434_s16 = inlined_call_operand.vmem [shape: f32[1,32], index: 16, kind: input, shape index: {}]   ;;  %s11435_s17 = inlined_call_operand.hbm [shape: f32[16,32], index: 17, kind: output, shape index: {}]  }
   0x1   :  { %11457 = sst [smem:[#allocation20_spill]] %s11418_s0 }
   0x2   :  { %11458 = sst [smem:[#allocation21_spill]] %s11419_s1 }
   0x3   :  { %s11459_s26 = sld [smem:[#allocation21_spill]]  ;;  %v11438_v3 = vmov 0.0|0.0   ;;  %vm9853_vm0 = vmmov 0   ;;  %v11441_v11 = vmov 0.0   ;;  %s11460_s22 = sld [smem:[#allocation20_spill]]  ;;  %vm254_vm1 = vcmask 261120  }
   0x4   :  { %9365 = vmatprep.subr.bf16.mxu0 %v11438_v3  ;;  %9371 = vmatprep.subr.bf16.mxu1 %v11438_v3 }
   0x5   :  { %8545 = vmatprep.mubr.msk.f32.mxu0 %vm9853_vm0, %v11441_v11  ;;  %8556 = vmatprep.mubr.msk.f32.mxu1 %vm9853_vm0, %v11441_v11 }
   0x9   :  { %v57_v0 = vld [vmem:[%s11459_s26] sm:$0xff]  ;;  %v58_v1 = vld [vmem:[%s11459_s26 + $0x8] sm:$0xff]  ;;  %v59_v6 = vld [vmem:[%s11459_s26 + $0x10] sm:$0xff] }
   0xa   :  { %v61_v2 = vld [vmem:[%s11459_s26 + $0x20] sm:$0xff]  ;;  %v9959_v4 = vpack.c.bf16 %v58_v1, %v57_v0  ;;  %v62_v5 = vld [vmem:[%s11459_s26 + $0x28] sm:$0xff]  ;;  %v60_v7 = vld [vmem:[%s11459_s26 + $0x18] sm:$0xff] }
   0xb   :  { %v9970_v8 = vpack.c.bf16 %v62_v5, %v61_v2  ;;  %v63_v9 = vld [vmem:[%s11459_s26 + $0x30] sm:$0xff]  ;;  %v64_v10 = vld [vmem:[%s11459_s26 + $0x38] sm:$0xff]  ;;  %v9983_v12 = vpack.c.bf16 %v60_v7, %v59_v6  ;;  %v65_v14 = vld [vmem:[%s11459_s26 + $0x40] sm:$0xff] }
   0xc   :  { %9367 = vmatpush3.bf16.msra.mxu0 %v9959_v4  ;;  %v9987_v13 = vpack.c.bf16 %v64_v10, %v63_v9  ;;  %v66_v15 = vld [vmem:[%s11459_s26 + $0x48] sm:$0xff]  ;;  %v69_v16 = vld [vmem:[%s11459_s26 + $0x60] sm:$0xff]  ;;  %v67_v21 = vld [vmem:[%s11459_s26 + $0x50] sm:$0xff] }
   0xd   :  { %9373 = vmatpush3.bf16.msra.mxu1 %v9970_v8  ;;  %9368 = vmatprep.subr.bf16.mxu0 %v11438_v3  ;;  %v70_v17 = vld [vmem:[%s11459_s26 + $0x68] sm:$0xff]  ;;  %v10006_v18 = vld [vmem:[%s11460_s22] sm:$0xff]  ;;  %v10008_v19 = vpack.c.bf16 %v66_v15, %v65_v14  ;;  %v68_v22 = vld [vmem:[%s11459_s26 + $0x58] sm:$0xff] }
   0xe   :  { %9374 = vmatprep.subr.bf16.mxu1 %v11438_v3  ;;  %v10012_v20 = vpack.c.bf16 %v70_v17, %v69_v16  ;;  %v71_v23 = vld [vmem:[%s11459_s26 + $0x70] sm:$0xff]  ;;  %v72_v24 = vld [vmem:[%s11459_s26 + $0x78] sm:$0xff]  ;;  %v10032_v25 = vpack.c.bf16 %v68_v22, %v67_v21  ;;  %v73_v27 = vld [vmem:[%s11459_s26 + $0x80] sm:$0xff] }
   0xf   :  { %v10036_v26 = vpack.c.bf16 %v72_v24, %v71_v23  ;;  %v74_v28 = vld [vmem:[%s11459_s26 + $0x88] sm:$0xff]  ;;  %v77_v29 = vld [vmem:[%s11459_s26 + $0xa0] sm:$0xff]  ;;  %v75_v33 = vld [vmem:[%s11459_s26 + $0x90] sm:$0xff] }
  0x10   :  { %9370 = vmatpush3.bf16.msra.mxu0 %v9983_v12  ;;  %v78_v30 = vld [vmem:[%s11459_s26 + $0xa8] sm:$0xff]  ;;  %v10056_v31 = vpack.c.bf16 %v74_v28, %v73_v27  ;;  %v76_v34 = vld [vmem:[%s11459_s26 + $0x98] sm:$0xff]  ;;  %v79_v35 = vld [vmem:[%s11459_s26 + $0xb0] sm:$0xff] }
  0x11   :  { %9376 = vmatpush3.bf16.msra.mxu1 %v9987_v13  ;;  %9377 = vmatprep.subr.bf16.mxu0 %v11438_v3  ;;  %v10060_v32 = vpack.c.bf16 %v78_v30, %v77_v29  ;;  %v80_v36 = vld [vmem:[%s11459_s26 + $0xb8] sm:$0xff]  ;;  %v10080_v37 = vpack.c.bf16 %v76_v34, %v75_v33  ;;  %v81_v39 = vld [vmem:[%s11459_s26 + $0xc0] sm:$0xff]  ;;  %v82_v40 = vld [vmem:[%s11459_s26 + $0xc8] sm:$0xff] }
  0x12   :  { %9383 = vmatprep.subr.bf16.mxu1 %v11438_v3  ;;  %v10084_v38 = vpack.c.bf16 %v80_v36, %v79_v35  ;;  %v85_v41 = vld [vmem:[%s11459_s26 + $0xe0] sm:$0xff]  ;;  %v86_v42 = vld [vmem:[%s11459_s26 + $0xe8] sm:$0xff]  ;;  %v10109_v44 = vpack.c.bf16 %v82_v40, %v81_v39 }
  0x13   :  { %8546 = vmatmul.mubr.msk.f32.vlgmr.msra.gmra.mrb[0].mxu0 %vm254_vm1, %v10006_v18  ;;  %v10107_v43 = vld [vmem:[%s11460_s22 + $0x8] sm:$0xff] }
  0x14   :  { %8557 = vmatmul.mubr.msk.f32.vlgmr.msra.gmra.mrb[0].mxu1 %vm254_vm1, %v10006_v18  ;;  %9379 = vmatpush3.bf16.msra.mxu0 %v10008_v19 }
  0x15   :  { %9385 = vmatpush3.bf16.msra.mxu1 %v10012_v20  ;;  %9380 = vmatprep.subr.bf16.mxu0 %v11438_v3 }
  0x16   :  { %9386 = vmatprep.subr.bf16.mxu1 %v11438_v3  ;;  %8567 = vmatprep.mubr.msk.f32.mxu0 %vm9853_vm0, %v11441_v11 }
  0x17   :  { %8578 = vmatprep.mubr.msk.f32.mxu1 %vm9853_vm0, %v11441_v11 }
  0x18   :  { %9382 = vmatpush3.bf16.msra.mxu0 %v10032_v25 }
  0x19   :  { %9388 = vmatpush3.bf16.msra.mxu1 %v10036_v26  ;;  %9389 = vmatprep.subr.bf16.mxu0 %v11438_v3 }
  0x1a   :  { %9395 = vmatprep.subr.bf16.mxu1 %v11438_v3 }
  0x1b   :  { %8568 = vmatmul.mubr.msk.f32.vlgmr.msra.gmra.mrb[2].mxu0 %vm254_vm1, %v10006_v18 }
  0x1c   :  { %8579 = vmatmul.mubr.msk.f32.vlgmr.msra.gmra.mrb[2].mxu1 %vm254_vm1, %v10006_v18  ;;  %9391 = vmatpush3.bf16.msra.mxu0 %v10056_v31 }
  0x1d   :  { %9397 = vmatpush3.bf16.msra.mxu1 %v10060_v32  ;;  %9392 = vmatprep.subr.bf16.mxu0 %v11438_v3 }
  0x1e   :  { %9398 = vmatprep.subr.bf16.mxu1 %v11438_v3  ;;  %8589 = vmatprep.mubr.msk.f32.mxu0 %vm9853_vm0, %v11441_v11 }
  0x1f   :  { %8600 = vmatprep.mubr.msk.f32.mxu1 %vm9853_vm0, %v11441_v11 }
  0x20   :  { %9394 = vmatpush3.bf16.msra.mxu0 %v10080_v37 }
  0x21   :  { %22 = vsyncpa [#allocation3], 0  ;;  %9400 = vmatpush3.bf16.msra.mxu1 %v10084_v38  ;;  %9401 = vmatprep.subr.bf16.mxu0 %v11438_v3  ;;  %v10113_v45 = vpack.c.bf16 %v86_v42, %v85_v41  ;;  %v83_v46 = vld [vmem:[%s11459_s26 + $0xd0] sm:$0xff]  ;;  %v84_v47 = vld [vmem:[%s11459_s26 + $0xd8] sm:$0xff]  ;;  %vm2037_vm2 = vcmask 64512   ;;  %vm4072_vm3 = vcmask 523264  }
  0x22   :  { %9407 = vmatprep.subr.bf16.mxu1 %v11438_v3  ;;  %v87_v48 = vld [vmem:[%s11459_s26 + $0xf0] sm:$0xff]  ;;  %v88_v49 = vld [vmem:[%s11459_s26 + $0xf8] sm:$0xff]  ;;  %v10133_v50 = vpack.c.bf16 %v84_v47, %v83_v46  ;;  %v97_v52 = vld [vmem:[%s11421_s3] sm:$0xff]  ;;  %s9855_s1 = smov [#allocation2]  }
  0x23   :  { %8590 = vmatmul.mubr.msk.f32.vlgmr.msra.gmra.mrb[4].mxu0 %vm254_vm1, %v10107_v43  ;;  %v10137_v51 = vpack.c.bf16 %v88_v49, %v87_v48  ;;  %v98_v53 = vld [vmem:[%s11421_s3 + $0x8] sm:$0xff]  ;;  %v101_v54 = vld [vmem:[%s11421_s3 + $0x20] sm:$0xff]  ;;  %v99_v58 = vld [vmem:[%s11421_s3 + $0x10] sm:$0xff]  ;;  %s8007_s20 = sshll.u32 %s9855_s1, 4  ;;  %s8008_s20 = int_to_ptr.vmem [resolvable:$true] %s8007_s20 }
  0x24   :  { %8601 = vmatmul.mubr.msk.f32.vlgmr.msra.gmra.mrb[4].mxu1 %vm254_vm1, %v10107_v43  ;;  %9403 = vmatpush3.bf16.msra.mxu0 %v10109_v44  ;;  %v102_v55 = vld [vmem:[%s11421_s3 + $0x28] sm:$0xff]  ;;  %v10157_v56 = vpack.c.bf16 %v98_v53, %v97_v52  ;;  %v100_v59 = vld [vmem:[%s11421_s3 + $0x18] sm:$0xff]  ;;  %v103_v60 = vld [vmem:[%s11421_s3 + $0x30] sm:$0xff]  ;;  %p9833_p1 = scmp.lt.s32.totalorder %s8008_s20, %s8008_s20 }
  0x25   :  { %9409 = vmatpush3.bf16.msra.mxu1 %v10113_v45  ;;  %9404 = vmatprep.subr.bf16.mxu0 %v11438_v3  ;;  %v10161_v57 = vpack.c.bf16 %v102_v55, %v101_v54  ;;  %v104_v61 = vld [vmem:[%s11421_s3 + $0x38] sm:$0xff]  ;;  %v10181_v62 = vpack.c.bf16 %v100_v59, %v99_v58  ;;  %v105_v0 = vld [vmem:[%s11421_s3 + $0x40] sm:$0xff]  ;;  %v106_v1 = vld [vmem:[%s11421_s3 + $0x48] sm:$0xff] }
  0x26   :  { %9410 = vmatprep.subr.bf16.mxu1 %v11438_v3  ;;  %8611 = vmatprep.mubr.msk.f32.mxu0 %vm9853_vm0, %v11441_v11  ;;  %v10185_v63 = vpack.c.bf16 %v104_v61, %v103_v60  ;;  %v109_v2 = vld [vmem:[%s11421_s3 + $0x60] sm:$0xff]  ;;  %v110_v5 = vld [vmem:[%s11421_s3 + $0x68] sm:$0xff]  ;;  %v10205_v6 = vpack.c.bf16 %v106_v1, %v105_v0  ;;  %v107_v9 = vld [vmem:[%s11421_s3 + $0x50] sm:$0xff] }
  0x27   :  { %8622 = vmatprep.mubr.msk.f32.mxu1 %vm9853_vm0, %v11441_v11  ;;  %v10209_v7 = vpack.c.bf16 %v110_v5, %v109_v2  ;;  %v108_v10 = vld [vmem:[%s11421_s3 + $0x58] sm:$0xff]  ;;  %v111_v14 = vld [vmem:[%s11421_s3 + $0x70] sm:$0xff]  ;;  %v113_v21 = vld [vmem:[%s11421_s3 + $0x80] sm:$0xff] }
  0x28   :  { %9406 = vmatpush3.bf16.msra.mxu0 %v10133_v50  ;;  %v112_v15 = vld [vmem:[%s11421_s3 + $0x78] sm:$0xff]  ;;  %v10229_v16 = vpack.c.bf16 %v108_v10, %v107_v9  ;;  %v114_v22 = vld [vmem:[%s11421_s3 + $0x88] sm:$0xff]  ;;  %v117_v23 = vld [vmem:[%s11421_s3 + $0xa0] sm:$0xff] }
  0x29   :  { %9412 = vmatpush3.bf16.msra.mxu1 %v10137_v51  ;;  %9413 = vmatprep.subr.bf16.mxu0 %v11438_v3  ;;  %v10233_v17 = vpack.c.bf16 %v112_v15, %v111_v14  ;;  %v118_v24 = vld [vmem:[%s11421_s3 + $0xa8] sm:$0xff]  ;;  %v10253_v27 = vpack.c.bf16 %v114_v22, %v113_v21  ;;  %v115_v29 = vld [vmem:[%s11421_s3 + $0x90] sm:$0xff]  ;;  %v116_v30 = vld [vmem:[%s11421_s3 + $0x98] sm:$0xff] }
  0x2a   :  { %9419 = vmatprep.subr.bf16.mxu1 %v11438_v3  ;;  %v10257_v28 = vpack.c.bf16 %v118_v24, %v117_v23  ;;  %v119_v33 = vld [vmem:[%s11421_s3 + $0xb0] sm:$0xff]  ;;  %v120_v34 = vld [vmem:[%s11421_s3 + $0xb8] sm:$0xff]  ;;  %v10277_v35 = vpack.c.bf16 %v116_v30, %v115_v29  ;;  %v121_v39 = vld [vmem:[%s11421_s3 + $0xc0] sm:$0xff] }
  0x2b   :  { %8612 = vmatmul.mubr.msk.f32.vlgmr.msra.gmra.mrb[6].mxu0 %vm254_vm1, %v10107_v43  ;;  %v10281_v36 = vpack.c.bf16 %v120_v34, %v119_v33  ;;  %v122_v40 = vld [vmem:[%s11421_s3 + $0xc8] sm:$0xff]  ;;  %v125_v41 = vld [vmem:[%s11421_s3 + $0xe0] sm:$0xff]  ;;  %v123_v48 = vld [vmem:[%s11421_s3 + $0xd0] sm:$0xff] }
  0x2c   :  { %8623 = vmatmul.mubr.msk.f32.vlgmr.msra.gmra.mrb[6].mxu1 %vm254_vm1, %v10107_v43  ;;  %9415 = vmatpush3.bf16.msra.mxu0 %v10157_v56  ;;  %v126_v42 = vld [vmem:[%s11421_s3 + $0xe8] sm:$0xff]  ;;  %v10301_v46 = vpack.c.bf16 %v122_v40, %v121_v39  ;;  %v124_v49 = vld [vmem:[%s11421_s3 + $0xd8] sm:$0xff]  ;;  %v127_v52 = vld [vmem:[%s11421_s3 + $0xf0] sm:$0xff] }
  0x2d   :  { %9421 = vmatpush3.bf16.msra.mxu1 %v10161_v57  ;;  %9416 = vmatprep.subr.bf16.mxu0 %v11438_v3  ;;  %v10305_v47 = vpack.c.bf16 %v126_v42, %v125_v41  ;;  %v128_v53 = vld [vmem:[%s11421_s3 + $0xf8] sm:$0xff]  ;;  %v10325_v54 = vpack.c.bf16 %v124_v49, %v123_v48  ;;  %v137_v58 = vld [vmem:[%s11423_s5] sm:$0xff]  ;;  %v138_v59 = vld [vmem:[%s11423_s5 + $0x8] sm:$0xff] }
  0x2e   :  { %9422 = vmatprep.subr.bf16.mxu1 %v11438_v3  ;;  %8633 = vmatprep.mubr.msk.f32.mxu0 %vm9853_vm0, %v11441_v11  ;;  %v10329_v55 = vpack.c.bf16 %v128_v53, %v127_v52  ;;  %v10343_v60 = vpack.c.bf16 %v138_v59, %v137_v58  ;;  %v139_v61 = vld [vmem:[%s11423_s5 + $0x10] sm:$0xff]  ;;  %v140_v0 = vld [vmem:[%s11423_s5 + $0x18] sm:$0xff]  ;;  %v141_v2 = vld [vmem:[%s11423_s5 + $0x20] sm:$0xff] }
  0x2f   :  { %8644 = vmatprep.mubr.msk.f32.mxu1 %vm9853_vm0, %v11441_v11  ;;  %v10364_v1 = vpack.c.bf16 %v140_v0, %v139_v61  ;;  %v142_v5 = vld [vmem:[%s11423_s5 + $0x28] sm:$0xff]  ;;  %v145_v9 = vld [vmem:[%s11423_s5 + $0x40] sm:$0xff]  ;;  %v143_v21 = vld [vmem:[%s11423_s5 + $0x30] sm:$0xff] }
  0x30   :  { %9418 = vmatpush3.bf16.msra.mxu0 %v10181_v62  ;;  %11461 = vst [vmem:[#allocation5_spill] sm:$0xff] %v10329_v55  ;;  %v10376_v10 = vpack.c.bf16 %v142_v5, %v141_v2  ;;  %v146_v14 = vld [vmem:[%s11423_s5 + $0x48] sm:$0xff]  ;;  %v144_v22 = vld [vmem:[%s11423_s5 + $0x38] sm:$0xff]  ;;  %v147_v23 = vld [vmem:[%s11423_s5 + $0x50] sm:$0xff] }
  0x31   :  { %9424 = vmatpush3.bf16.msra.mxu1 %v10185_v63  ;;  %9425 = vmatprep.subr.bf16.mxu0 %v11438_v3  ;;  %v10382_v15 = vpack.c.bf16 %v146_v14, %v145_v9  ;;  %v10401_v24 = vpack.c.bf16 %v144_v22, %v143_v21  ;;  %v148_v29 = vld [vmem:[%s11423_s5 + $0x58] sm:$0xff]  ;;  %v149_v33 = vld [vmem:[%s11423_s5 + $0x60] sm:$0xff]  ;;  %v150_v34 = vld [vmem:[%s11423_s5 + $0x68] sm:$0xff] }
  0x32   :  { %9431 = vmatprep.subr.bf16.mxu1 %v11438_v3  ;;  %11462 = vst [vmem:[#allocation6_spill] sm:$0xff] %v10376_v10  ;;  %v10406_v30 = vpack.c.bf16 %v148_v29, %v147_v23  ;;  %v153_v39 = vld [vmem:[%s11423_s5 + $0x80] sm:$0xff]  ;;  %v10418_v40 = vpack.c.bf16 %v150_v34, %v149_v33  ;;  %v154_v41 = vld [vmem:[%s11423_s5 + $0x88] sm:$0xff]  ;;  %v151_v48 = vld [vmem:[%s11423_s5 + $0x70] sm:$0xff] }
  0x33   :  { %8634 = vmatmul.mubr.msk.f32.vlgmr.msra.gmra.mrb[8].mxu0 %vm254_vm1, %v10006_v18  ;;  %11463 = vst [vmem:[#allocation7_spill] sm:$0xff] %v10382_v15  ;;  %11464 = vst [vmem:[#allocation8_spill] sm:$0xff] %v10401_v24  ;;  %v10425_v42 = vpack.c.bf16 %v154_v41, %v153_v39  ;;  %v152_v49 = vld [vmem:[%s11423_s5 + $0x78] sm:$0xff]  ;;  %v155_v52 = vld [vmem:[%s11423_s5 + $0x90] sm:$0xff] }
  0x34   :  { %8645 = vmatmul.mubr.msk.f32.vlgmr.msra.gmra.mrb[8].mxu1 %vm254_vm1, %v10006_v18  ;;  %9427 = vmatpush3.bf16.msra.mxu0 %v10205_v6  ;;  %11465 = vst [vmem:[#allocation9_spill] sm:$0xff] %v10406_v30  ;;  %11466 = vst [vmem:[#allocation10_spill] sm:$0xff] %v10418_v40  ;;  %v10445_v53 = vpack.c.bf16 %v152_v49, %v151_v48  ;;  %v156_v58 = vld [vmem:[%s11423_s5 + $0x98] sm:$0xff]  ;;  %v157_v61 = vld [vmem:[%s11423_s5 + $0xa0] sm:$0xff] }
  0x35   :  { %9433 = vmatpush3.bf16.msra.mxu1 %v10209_v7  ;;  %9428 = vmatprep.subr.bf16.mxu0 %v11438_v3  ;;  %11467 = vst [vmem:[#allocation11_spill] sm:$0xff] %v10425_v42  ;;  %v10452_v59 = vpack.c.bf16 %v156_v58, %v155_v52  ;;  %v158_v0 = vld [vmem:[%s11423_s5 + $0xa8] sm:$0xff]  ;;  %v161_v2 = vld [vmem:[%s11423_s5 + $0xc0] sm:$0xff]  ;;  %v159_v21 = vld [vmem:[%s11423_s5 + $0xb0] sm:$0xff] }
  0x36   :  { %9434 = vmatprep.subr.bf16.mxu1 %v11438_v3  ;;  %8655 = vmatprep.mubr.msk.f32.mxu0 %vm9853_vm0, %v11441_v11  ;;  %11468 = vst [vmem:[#allocation12_spill] sm:$0xff] %v10445_v53  ;;  %v10466_v5 = vpack.c.bf16 %v158_v0, %v157_v61  ;;  %v162_v9 = vld [vmem:[%s11423_s5 + $0xc8] sm:$0xff]  ;;  %v160_v22 = vld [vmem:[%s11423_s5 + $0xb8] sm:$0xff]  ;;  %v165_v34 = vld [vmem:[%s11423_s5 + $0xe0] sm:$0xff] }
  0x37   :  { %8666 = vmatprep.mubr.msk.f32.mxu1 %vm9853_vm0, %v11441_v11  ;;  %11469 = vst [vmem:[#allocation13_spill] sm:$0xff] %v10452_v59  ;;  %v10473_v14 = vpack.c.bf16 %v162_v9, %v161_v2  ;;  %v10493_v23 = vpack.c.bf16 %v160_v22, %v159_v21  ;;  %v164_v29 = vld [vmem:[%s11423_s5 + $0xd8] sm:$0xff]  ;;  %v166_v39 = vld [vmem:[%s11423_s5 + $0xe8] sm:$0xff]  ;;  %v167_v48 = vld [vmem:[%s11423_s5 + $0xf0] sm:$0xff] }
  0x38   :  { %9430 = vmatpush3.bf16.msra.mxu0 %v10229_v16  ;;  %11470 = vst [vmem:[#allocation14_spill] sm:$0xff] %v10466_v5  ;;  %v10511_v41 = vpack.c.bf16 %v166_v39, %v165_v34  ;;  %v168_v49 = vld [vmem:[%s11423_s5 + $0xf8] sm:$0xff] }
  0x39   :  { %9436 = vmatpush3.bf16.msra.mxu1 %v10233_v17  ;;  %9437 = vmatprep.subr.bf16.mxu0 %v11438_v3  ;;  %11471 = vst [vmem:[#allocation15_spill] sm:$0xff] %v10473_v14  ;;  %11472 = vst [vmem:[#allocation16_spill] sm:$0xff] %v10493_v23  ;;  %v10530_v52 = vpack.c.bf16 %v168_v49, %v167_v48 }
  0x3a   :  { %9443 = vmatprep.subr.bf16.mxu1 %v11438_v3  ;;  %11474 = vst [vmem:[#allocation18_spill] sm:$0xff] %v10511_v41 }
  0x3b   :  { %8656 = vmatmul.mubr.msk.f32.vlgmr.msra.gmra.mrb[10].mxu0 %vm254_vm1, %v10006_v18  ;;  %11475 = vst [vmem:[#allocation19_spill] sm:$0xff] %v10530_v52 }
  0x3c   :  { %8667 = vmatmul.mubr.msk.f32.vlgmr.msra.gmra.mrb[10].mxu1 %vm254_vm1, %v10006_v18  ;;  %9439 = vmatpush3.bf16.msra.mxu0 %v10253_v27 }
  0x3d   :  { %9445 = vmatpush3.bf16.msra.mxu1 %v10257_v28  ;;  %9440 = vmatprep.subr.bf16.mxu0 %v11438_v3 }
  0x3e   :  { %9446 = vmatprep.subr.bf16.mxu1 %v11438_v3  ;;  %8677 = vmatprep.mubr.msk.f32.mxu0 %vm9853_vm0, %v11441_v11 }
  0x3f   :  { %8688 = vmatprep.mubr.msk.f32.mxu1 %vm9853_vm0, %v11441_v11 }
  0x40   :  { %9442 = vmatpush3.bf16.msra.mxu0 %v10277_v35 }
  0x41   :  { %9448 = vmatpush3.bf16.msra.mxu1 %v10281_v36  ;;  %9449 = vmatprep.subr.bf16.mxu0 %v11438_v3 }
  0x42   :  { %9455 = vmatprep.subr.bf16.mxu1 %v11438_v3 }
  0x43   :  { %8678 = vmatmul.mubr.msk.f32.vlgmr.msra.gmra.mrb[12].mxu0 %vm254_vm1, %v10107_v43 }
  0x44   :  { %8689 = vmatmul.mubr.msk.f32.vlgmr.msra.gmra.mrb[12].mxu1 %vm254_vm1, %v10107_v43  ;;  %9451 = vmatpush3.bf16.msra.mxu0 %v10301_v46 }
  0x45   :  { %9457 = vmatpush3.bf16.msra.mxu1 %v10305_v47  ;;  %9452 = vmatprep.subr.bf16.mxu0 %v11438_v3 }
  0x46   :  { %9458 = vmatprep.subr.bf16.mxu1 %v11438_v3  ;;  %8699 = vmatprep.mubr.msk.f32.mxu0 %vm9853_vm0, %v11441_v11 }
  0x47   :  { %8710 = vmatprep.mubr.msk.f32.mxu1 %vm9853_vm0, %v11441_v11 }
  0x48   :  { %9454 = vmatpush3.bf16.msra.mxu0 %v10325_v54 }
  0x49   :  { %9460 = vmatpush3.bf16.msra.mxu1 %v10329_v55  ;;  %9461 = vmatprep.subr.bf16.mxu0 %v11438_v3 }
  0x4a   :  { %9467 = vmatprep.subr.bf16.mxu1 %v11438_v3 }
  0x4b   :  { %8700 = vmatmul.mubr.msk.f32.vlgmr.msra.gmra.mrb[14].mxu0 %vm254_vm1, %v10107_v43 }
  0x4c   :  { %8711 = vmatmul.mubr.msk.f32.vlgmr.msra.gmra.mrb[14].mxu1 %vm254_vm1, %v10107_v43  ;;  %9463 = vmatpush3.bf16.msra.mxu0 %v10343_v60 }
  0x4d   :  { %9464 = vmatprep.subr.bf16.mxu0 %v11438_v3  ;;  %8721 = vmatprep.mubr.msk.f32.mxu0 %vm9853_vm0, %v11441_v11 }
  0x4e   :  { %8732 = vmatprep.mubr.msk.f32.mxu1 %vm9853_vm0, %v11441_v11  ;;  %9469 = vmatpush3.bf16.msra.mxu1 %v10376_v10 }
  0x4f   :  { %9470 = vmatprep.subr.bf16.mxu1 %v11438_v3 }
  0x50   :  { %9466 = vmatpush3.bf16.msra.mxu0 %v10364_v1 }
  0x51   :  { %9473 = vmatprep.subr.bf16.mxu0 %v11438_v3 }
  0x52   :  { %9472 = vmatpush3.bf16.msra.mxu1 %v10401_v24 }
  0x53   :  { %8722 = vmatmul.mubr.msk.f32.vlgmr.msra.gmra.mrb[16].mxu0 %vm254_vm1, %v10006_v18  ;;  %9479 = vmatprep.subr.bf16.mxu1 %v11438_v3 }
  0x54   :  { %9475 = vmatpush3.bf16.msra.mxu0 %v10382_v15  ;;  %8743 = vmatprep.mubr.msk.f32.mxu0 %vm9853_vm0, %v11441_v11 }
  0x55   :  { %9476 = vmatprep.subr.bf16.mxu0 %v11438_v3  ;;  %8733 = vmatmul.mubr.msk.f32.vlgmr.msra.gmra.mrb[16].mxu1 %vm254_vm1, %v10006_v18 }
  0x56   :  { %9481 = vmatpush3.bf16.msra.mxu1 %v10418_v40  ;;  %8754 = vmatprep.mubr.msk.f32.mxu1 %vm9853_vm0, %v11441_v11 }
  0x57   :  { %9482 = vmatprep.subr.bf16.mxu1 %v11438_v3 }
  0x58   :  { %9478 = vmatpush3.bf16.msra.mxu0 %v10406_v30 }
  0x59   :  { %9485 = vmatprep.subr.bf16.mxu0 %v11438_v3 }
  0x5a   :  { %9484 = vmatpush3.bf16.msra.mxu1 %v10445_v53 }
  0x5b   :  { %8744 = vmatmul.mubr.msk.f32.vlgmr.msra.gmra.mrb[18].mxu0 %vm254_vm1, %v10006_v18  ;;  %9491 = vmatprep.subr.bf16.mxu1 %v11438_v3 }
  0x5c   :  { %9487 = vmatpush3.bf16.msra.mxu0 %v10425_v42  ;;  %8765 = vmatprep.mubr.msk.f32.mxu0 %vm9853_vm0, %v11441_v11 }
  0x5d   :  { %9488 = vmatprep.subr.bf16.mxu0 %v11438_v3  ;;  %8755 = vmatmul.mubr.msk.f32.vlgmr.msra.gmra.mrb[18].mxu1 %vm254_vm1, %v10006_v18  ;;  %v163_v18 = vld [vmem:[%s11423_s5 + $0xd0] sm:$0xff] }
  0x5e   :  { %9493 = vmatpush3.bf16.msra.mxu1 %v10466_v5  ;;  %8776 = vmatprep.mubr.msk.f32.mxu1 %vm9853_vm0, %v11441_v11  ;;  %v10500_v33 = vpack.c.bf16 %v164_v29, %v163_v18  ;;  %v8019_v5 = vld [vmem:[%s11420_s2 + $0x1] ss:$0 sm:$0xff] }
  0x5f   :  { %9494 = vmatprep.subr.bf16.mxu1 %v11438_v3 }
  0x60   :  { %9490 = vmatpush3.bf16.msra.mxu0 %v10452_v59  ;;  %11473 = vst [vmem:[#allocation17_spill] sm:$0xff] %v10500_v33 }
  0x61   :  { %9497 = vmatprep.subr.bf16.mxu0 %v11438_v3 }
  0x62   :  { %9496 = vmatpush3.bf16.msra.mxu1 %v10493_v23  ;;  %v11476_v23 = vmov 0.0  }
  0x63   :  { %8766 = vmatmul.mubr.msk.f32.vlgmr.msra.gmra.mrb[20].mxu0 %vm254_vm1, %v10107_v43  ;;  %9503 = vmatprep.subr.bf16.mxu1 %v11438_v3 }
  0x64   :  { %9499 = vmatpush3.bf16.msra.mxu0 %v10473_v14  ;;  %8787 = vmatprep.mubr.msk.f32.mxu0 %vm9853_vm0, %v11441_v11 }
  0x65   :  { %9500 = vmatprep.subr.bf16.mxu0 %v11438_v3  ;;  %8777 = vmatmul.mubr.msk.f32.vlgmr.msra.gmra.mrb[20].mxu1 %vm254_vm1, %v10107_v43 }
  0x66   :  { %9505 = vmatpush3.bf16.msra.mxu1 %v10511_v41  ;;  %8798 = vmatprep.mubr.msk.f32.mxu1 %vm9853_vm0, %v11441_v11 }
  0x67   :  { %9506 = vmatprep.subr.bf16.mxu1 %v11438_v3 }
  0x68   :  { %9502 = vmatpush3.bf16.msra.mxu0 %v10500_v33  ;;  %v8036_v33 = vld [vmem:[%s11422_s4 + $0x2] ss:$0 sm:$0xff] }
  0x69   :  { %8801 = vmatprep.subr.mxu0 %v11441_v11 }
  0x6a   :  { %9508 = vmatpush3.bf16.msra.mxu1 %v10530_v52 }
  0x6b   :  { %8788 = vmatmul.mubr.msk.f32.vlgmr.msra.gmra.mrb[22].mxu0 %vm254_vm1, %v10107_v43  ;;  %8816 = vmatprep.subr.mxu1 %v11441_v11 }
  0x6c   :  { %8803 = vmatprep.mubr.msk.f32.mxu0 %vm9853_vm0, %v11441_v11 }
  0x6d   :  { %8799 = vmatmul.mubr.msk.f32.vlgmr.msra.gmra.mrb[22].mxu1 %vm254_vm1, %v10107_v43 }
  0x6e   :  { %8818 = vmatprep.mubr.msk.f32.mxu1 %vm9853_vm0, %v11441_v11 }
  0xe6   :  { %v324_v58 = vpop.f32.mrb[0].mxu0 }
  0xe7   :  { %v8547_v61 = vpop.f32.mrb[1].mxu0  ;;  %v394_v0 = vpop.f32.mrb[0].mxu1 }
  0xe8   :  { %v8558_v2 = vpop.f32.mrb[1].mxu1  ;;  %v8034_v61 = vld [vmem:[%s11422_s4] ss:$0 sm:$0xff] }
  0xe9   :  { %v8035_v2 = vld [vmem:[%s11422_s4 + $0x1] ss:$0 sm:$0xff] }
  0xee   :  { %v464_v9 = vpop.f32.mrb[2].mxu0 }
  0xef   :  { %v8569_v21 = vpop.f32.mrb[3].mxu0  ;;  %v534_v22 = vpop.f32.mrb[2].mxu1 }
  0xf0   :  { %v8580_v18 = vpop.f32.mrb[3].mxu1  ;;  %v8018_v21 = vld [vmem:[%s11420_s2] ss:$0 sm:$0xff] }
  0xf6   :  { %v607_v29 = vpop.f32.mrb[4].mxu0 }
  0xf7   :  { %v8591_v34 = vpop.f32.mrb[5].mxu0  ;;  %v677_v39 = vpop.f32.mrb[4].mxu1 }
  0xf8   :  { %v8602_v48 = vpop.f32.mrb[5].mxu1 }
  0xfe   :  { %v10540_v49 = vpop.f32.mrb[6].mxu0 }
  0xff   :  { %v8613_v3 = vpop.f32.mrb[7].mxu0  ;;  %v10542_v52 = vpop.f32.mrb[6].mxu1 }
 0x100   :  { %v8624_v43 = vpop.f32.mrb[7].mxu1 }
 0x101   :  { %v325_v43 = vadd.f32 %v8018_v21, %v324_v58  ;;  %v395_v58 = vadd.f32 %v8019_v5, %v394_v0  ;;  %v8038_v0 = vld [vmem:[%s11422_s4 + $0x4] ss:$0 sm:$0xff] }
 0x106   :  { %v935_v11 = vpop.f32.mrb[8].mxu0 }
 0x107   :  { %v936_v18 = vadd.f32 %v8034_v61, %v935_v11  ;;  %v8635_v34 = vpop.f32.mrb[9].mxu0  ;;  %v1005_v3 = vpop.f32.mrb[8].mxu1  ;;  %v8037_v11 = vld [vmem:[%s11422_s4 + $0x3] ss:$0 sm:$0xff] }
 0x108   :  { %v8646_v48 = vpop.f32.mrb[9].mxu1  ;;  %v1006_v41 = vadd.f32 %v8035_v2, %v1005_v3  ;;  %v8020_v2 = vld [vmem:[%s11420_s2 + $0x2] ss:$0 sm:$0xff] }
 0x109   :  { %8802 = vmatpush3.xpose.msk.msra.mxu0 %vm2037_vm2, %v936_v18  ;;  %v465_v5 = vadd.f32 %v8020_v2, %v464_v9  ;;  %v8023_v2 = vld [vmem:[%s11420_s2 + $0x5] ss:$0 sm:$0xff] }
 0x10a   :  { %8806 = vmatprep.subr.mxu0 %v11476_v23 }
 0x10c   :  { %8804 = vmatmul.mubr.msk.f32.vlgmr.msra.gmra.mrb[24].mxu0 %vm2037_vm2, %v325_v43  ;;  %v8039_v43 = vld [vmem:[%s11422_s4 + $0x5] ss:$0 sm:$0xff] }
 0x10d   :  { %8807 = vmatpush3.xpose.msk.msra.mxu0 %vm2037_vm2, %v1006_v41  ;;  %8808 = vmatprep.mubr.msk.f32.mxu0 %vm9853_vm0, %v11476_v23  ;;  %v8021_v41 = vld [vmem:[%s11420_s2 + $0x3] ss:$0 sm:$0xff] }
 0x10e   :  { %v1075_v61 = vpop.f32.mrb[10].mxu0  ;;  %8811 = vmatprep.subr.mxu0 %v11476_v23 }
 0x10f   :  { %v1076_v21 = vadd.f32 %v8036_v33, %v1075_v61  ;;  %v1145_v18 = vpop.f32.mrb[10].mxu1  ;;  %v8657_v34 = vpop.f32.mrb[11].mxu0  ;;  %v535_v33 = vadd.f32 %v8021_v41, %v534_v22  ;;  %v8022_v22 = vld [vmem:[%s11420_s2 + $0x4] ss:$0 sm:$0xff]  ;;  %v678_v41 = vadd.f32 %v8023_v2, %v677_v39  ;;  %v8024_v39 = vld [vmem:[%s11420_s2 + $0x6] ss:$0 sm:$0xff] }
 0x110   :  { %v1146_v3 = vadd.f32 %v8037_v11, %v1145_v18  ;;  %8809 = vmatmul.mubr.msk.f32.vlgmr.msra.gmra.mrb[26].mxu0 %vm2037_vm2, %v395_v58  ;;  %v8668_v48 = vpop.f32.mrb[11].mxu1  ;;  %v608_v34 = vadd.f32 %v8022_v22, %v607_v29 }
 0x111   :  { %8812 = vmatpush3.xpose.msk.msra.mxu0 %vm2037_vm2, %v1076_v21  ;;  %8813 = vmatprep.mubr.msk.f32.mxu0 %vm9853_vm0, %v11476_v23  ;;  %v8041_v48 = vld [vmem:[%s11422_s4 + $0x7] ss:$0 sm:$0xff] }
 0x112   :  { %8817 = vmatpush3.xpose.msk.msra.mxu1 %vm2037_vm2, %v1146_v3  ;;  %8821 = vmatprep.subr.mxu0 %v11476_v23  ;;  %v8040_v3 = vld [vmem:[%s11422_s4 + $0x6] ss:$0 sm:$0xff] }
 0x113   :  { %8826 = vmatprep.subr.mxu1 %v11476_v23 }
 0x114   :  { %8814 = vmatmul.mubr.msk.f32.vlgmr.msra.gmra.mrb[28].mxu0 %vm2037_vm2, %v465_v5 }
 0x115   :  { %8819 = vmatmul.mubr.msk.f32.vlgmr.msra.gmra.mrb[24].mxu1 %vm2037_vm2, %v535_v33  ;;  %8823 = vmatprep.mubr.msk.f32.mxu0 %vm9853_vm0, %v11476_v23 }
 0x116   :  { %v1215_v9 = vpop.f32.mrb[12].mxu0  ;;  %8828 = vmatprep.mubr.msk.f32.mxu1 %vm9853_vm0, %v11476_v23 }
 0x117   :  { %v1216_v11 = vadd.f32 %v8038_v0, %v1215_v9  ;;  %v1285_v58 = vpop.f32.mrb[12].mxu1  ;;  %v8679_v61 = vpop.f32.mrb[13].mxu0 }
 0x118   :  { %v1286_v21 = vadd.f32 %v8039_v43, %v1285_v58  ;;  %v8690_v18 = vpop.f32.mrb[13].mxu1  ;;  %v8025_v43 = vld [vmem:[%s11420_s2 + $0x7] ss:$0 sm:$0xff] }
 0x119   :  { %8822 = vmatpush3.xpose.msk.msra.mxu0 %vm2037_vm2, %v1216_v11  ;;  %v748_v11 = vadd.f32 %v8024_v39, %v10540_v49  ;;  %v818_v58 = vadd.f32 %v8025_v43, %v10542_v52  ;;  %v8050_v49 = vld [vmem:[%s11424_s6] ss:$0 sm:$0xff]  ;;  %v8051_v52 = vld [vmem:[%s11424_s6 + $0x1] ss:$0 sm:$0xff] }
 0x11a   :  { %8827 = vmatpush3.xpose.msk.msra.mxu1 %vm2037_vm2, %v1286_v21  ;;  %8831 = vmatprep.subr.mxu0 %v11476_v23 }
 0x11b   :  { %8836 = vmatprep.subr.mxu1 %v11476_v23 }
 0x11c   :  { %8824 = vmatmul.mubr.msk.f32.vlgmr.msra.gmra.mrb[30].mxu0 %vm2037_vm2, %v608_v34 }
 0x11d   :  { %8829 = vmatmul.mubr.msk.f32.vlgmr.msra.gmra.mrb[26].mxu1 %vm2037_vm2, %v678_v41  ;;  %8833 = vmatprep.mubr.msk.f32.mxu0 %vm9853_vm0, %v11476_v23 }
 0x11e   :  { %v1355_v29 = vpop.f32.mrb[14].mxu0  ;;  %8838 = vmatprep.mubr.msk.f32.mxu1 %vm9853_vm0, %v11476_v23 }
 0x11f   :  { %v1356_v5 = vadd.f32 %v8040_v3, %v1355_v29  ;;  %v1425_v33 = vpop.f32.mrb[14].mxu1  ;;  %v8701_v0 = vpop.f32.mrb[15].mxu0 }
 0x120   :  { %v1426_v9 = vadd.f32 %v8041_v48, %v1425_v33  ;;  %v8712_v22 = vpop.f32.mrb[15].mxu1 }
 0x121   :  { %8832 = vmatpush3.xpose.msk.msra.mxu0 %vm2037_vm2, %v1356_v5 }
 0x122   :  { %8837 = vmatpush3.xpose.msk.msra.mxu1 %vm2037_vm2, %v1426_v9  ;;  %8841 = vmatprep.subr.mxu0 %v11476_v23 }
 0x123   :  { %8846 = vmatprep.subr.mxu1 %v11476_v23 }
 0x124   :  { %8834 = vmatmul.mubr.msk.f32.vlgmr.msra.gmra.mrb[32].mxu0 %vm2037_vm2, %v748_v11 }
 0x125   :  { %8839 = vmatmul.mubr.msk.f32.vlgmr.msra.gmra.mrb[28].mxu1 %vm2037_vm2, %v818_v58  ;;  %8843 = vmatprep.mubr.msk.f32.mxu0 %vm9853_vm0, %v11476_v23 }
 0x126   :  { %8848 = vmatprep.mubr.msk.f32.mxu1 %vm9853_vm0, %v11476_v23  ;;  %v1543_v61 = vpop.f32.mrb[16].mxu0 }
 0x127   :  { %v1544_v2 = vadd.f32 %v8050_v49, %v1543_v61  ;;  %v8723_v21 = vpop.f32.mrb[17].mxu0 }
 0x128   :  { %v1613_v18 = vpop.f32.mrb[16].mxu1 }
 0x129   :  { %8842 = vmatpush3.msra.mxu0 %v1544_v2  ;;  %v1614_v41 = vadd.f32 %v8051_v52, %v1613_v18  ;;  %v8734_v3 = vpop.f32.mrb[17].mxu1 }
 0x12a   :  { %8851 = vmatprep.subr.mxu0 %v11476_v23 }
 0x12b   :  { %8847 = vmatpush3.msra.mxu1 %v1614_v41 }
 0x12c   :  { %8856 = vmatprep.subr.mxu1 %v11476_v23 }
 0x12e   :  { %v10641_v34 = vpop.f32.mrb[18].mxu0 }
 0x12f   :  { %v8745_v48 = vpop.f32.mrb[19].mxu0 }
 0x130   :  { %v10644_v29 = vpop.f32.mrb[18].mxu1 }
 0x131   :  { %v8756_v5 = vpop.f32.mrb[19].mxu1 }
 0x136   :  { %v10646_v39 = vpop.f32.mrb[20].mxu0 }
 0x137   :  { %v8767_v33 = vpop.f32.mrb[21].mxu0 }
 0x138   :  { %v10650_v9 = vpop.f32.mrb[20].mxu1 }
 0x139   :  { %v8778_v22 = vpop.f32.mrb[21].mxu1 }
 0x13e   :  { %v10648_v0 = vpop.f32.mrb[22].mxu0 }
 0x13f   :  { %v8789_v43 = vpop.f32.mrb[23].mxu0 }
 0x140   :  { %v10652_v11 = vpop.f32.mrb[22].mxu1 }
 0x141   :  { %v8800_v58 = vpop.f32.mrb[23].mxu1 }
 0x1df   :  { %v2110_v49 = vpop.f32.mrb[24].mxu0 }
 0x1e0   :  { %v2646_v61 = vmul.f32 0.35355338, %v2110_v49  ;;  %v8805_v2 = vpop.f32.mrb[25].mxu0 }
 0x1e2   :  { %v2654_v21 = vsel %vm2037_vm2, %v2646_v61, -inf }
 0x1e3   :  { %2655 = vmax.xlane.f32.xlu0 %v2654_v21  ;;  %v2186_v52 = vpop.f32.mrb[26].mxu0 }
 0x1e4   :  { %v2647_v18 = vmul.f32 0.35355338, %v2186_v52  ;;  %v8810_v41 = vpop.f32.mrb[27].mxu0 }
 0x1e6   :  { %v2657_v3 = vsel %vm2037_vm2, %v2647_v18, -inf }
 0x1e7   :  { %2658 = vmax.xlane.f32.xlu0 %v2657_v3  ;;  %v2262_v48 = vpop.f32.mrb[28].mxu0 }
 0x1e8   :  { %v2338_v5 = vpop.f32.mrb[24].mxu1  ;;  %v2648_v33 = vmul.f32 0.35355338, %v2262_v48  ;;  %v8815_v43 = vpop.f32.mrb[29].mxu0 }
 0x1e9   :  { %v8820_v22 = vpop.f32.mrb[25].mxu1  ;;  %v2649_v53 = vmul.f32 0.35355338, %v2338_v5 }
 0x1ea   :  { %v2660_v58 = vsel %vm2037_vm2, %v2648_v33, -inf }
 0x1eb   :  { %2661 = vmax.xlane.f32.xlu1 %v2660_v58  ;;  %v2663_v49 = vsel %vm2037_vm2, %v2649_v53, -inf }
 0x1ef   :  { %2664 = vmax.xlane.f32.xlu1 %v2663_v49  ;;  %v2414_v2 = vpop.f32.mrb[30].mxu0 }
 0x1f0   :  { %v2490_v21 = vpop.f32.mrb[26].mxu1  ;;  %v2650_v14 = vmul.f32 0.35355338, %v2414_v2  ;;  %v8825_v52 = vpop.f32.mrb[31].mxu0 }
 0x1f1   :  { %v2651_v41 = vmul.f32 0.35355338, %v2490_v21  ;;  %v8830_v40 = vpop.f32.mrb[27].mxu1 }
 0x1f2   :  { %v2666_v3 = vsel %vm2037_vm2, %v2650_v14, -inf }
 0x1f3   :  { %v2669_v59 = vsel %vm2037_vm2, %v2651_v41, -inf  ;;  %2667 = vmax.xlane.f32.xlu0 %v2666_v3 }
 0x1f4   :  { %2670 = vmax.xlane.f32.xlu1 %v2669_v59 }
 0x1f7   :  { %v2566_v48 = vpop.f32.mrb[32].mxu0 }
 0x1f8   :  { %v2652_v5 = vmul.f32 0.35355338, %v2566_v48  ;;  %v2642_v43 = vpop.f32.mrb[28].mxu1  ;;  %v8835_v22 = vpop.f32.mrb[33].mxu0 }
 0x1f9   :  { %v2653_v58 = vmul.f32 0.35355338, %v2642_v43  ;;  %v8840_v24 = vpop.f32.mrb[29].mxu1 }
 0x1fa   :  { %v2672_v49 = vsel %vm2037_vm2, %v2652_v5, -inf }
 0x1fb   :  { %v2675_v42 = vsel %vm2037_vm2, %v2653_v58, -inf  ;;  %2673 = vmax.xlane.f32.xlu0 %v2672_v49 }
 0x1fc   :  { %2676 = vmax.xlane.f32.xlu1 %v2675_v42 }
 0x270   :  { %v2656_v2 = vpop.xlane.xlu0 %2655 }
 0x271   :  { %v2678_v40 = vsub.f32 %v2646_v61, %v2656_v2 }
 0x273   :  { %v2686_v21 = vmul.f32 1.442695, %v2678_v40 }
 0x274   :  { %v2659_v52 = vpop.xlane.xlu0 %2658 }
 0x275   :  { %9707 = vpow2.f32 %v2686_v21  ;;  %v2679_v10 = vsub.f32 %v2647_v18, %v2659_v52 }
 0x277   :  { %v2688_v3 = vmul.f32 1.442695, %v2679_v10 }
 0x278   :  { %v2662_v59 = vpop.xlane.xlu1 %2661 }
 0x279   :  { %9709 = vpow2.f32 %v2688_v3  ;;  %v2680_v48 = vsub.f32 %v2648_v33, %v2662_v59 }
 0x27b   :  { %v2690_v30 = vmul.f32 1.442695, %v2680_v48 }
 0x27c   :  { %v2665_v22 = vpop.xlane.xlu1 %2664 }
 0x27d   :  { %9711 = vpow2.f32 %v2690_v30  ;;  %v2681_v24 = vsub.f32 %v2649_v53, %v2665_v22 }
 0x27f   :  { %v9708_v43 = vpop.eup %9707  ;;  %v2692_v55 = vmul.f32 1.442695, %v2681_v24 }
 0x280   :  { %v2668_v15 = vpop.xlane.xlu0 %2667  ;;  %v2702_v49 = vsel %vm2037_vm2, %v9708_v43, 0.0 }
 0x281   :  { %9713 = vpow2.f32 %v2692_v55  ;;  %v2671_v42 = vpop.xlane.xlu1 %2670  ;;  %v2682_v61 = vsub.f32 %v2650_v14, %v2668_v15  ;;  %2703 = vadd.xlane.f32.xlu0 %v2702_v49 }
 0x282   :  { %v2683_v2 = vsub.f32 %v2651_v41, %v2671_v42 }
 0x283   :  { %v9710_v40 = vpop.eup %9709  ;;  %v2694_v18 = vmul.f32 1.442695, %v2682_v61 }
 0x284   :  { %v2696_v10 = vmul.f32 1.442695, %v2683_v2  ;;  %v2705_v21 = vsel %vm2037_vm2, %v9710_v40, 0.0 }
 0x285   :  { %9715 = vpow2.f32 %v2694_v18  ;;  %2706 = vadd.xlane.f32.xlu1 %v2705_v21  ;;  %v8052_v21 = vld [vmem:[%s11424_s6 + $0x2] ss:$0 sm:$0xff] }
 0x286   :  { %9717 = vpow2.f32 %v2696_v10 }
 0x287   :  { %v9712_v30 = vpop.eup %9711 }
 0x288   :  { %v2674_v53 = vpop.xlane.xlu0 %2673  ;;  %v2708_v33 = vsel %vm2037_vm2, %v9712_v30, 0.0 }
 0x289   :  { %v2677_v52 = vpop.xlane.xlu1 %2676  ;;  %v2684_v3 = vsub.f32 %v2652_v5, %v2674_v53  ;;  %2709 = vadd.xlane.f32.xlu0 %v2708_v33 }
 0x28a   :  { %v2685_v55 = vsub.f32 %v2653_v58, %v2677_v52 }
 0x28b   :  { %v9714_v59 = vpop.eup %9713  ;;  %v2698_v15 = vmul.f32 1.442695, %v2684_v3  ;;  %v1684_v3 = vadd.f32 %v8052_v21, %v10641_v34  ;;  %v8054_v34 = vld [vmem:[%s11424_s6 + $0x4] ss:$0 sm:$0xff] }
 0x28c   :  { %v2700_v14 = vmul.f32 1.442695, %v2685_v55  ;;  %v2711_v41 = vsel %vm2037_vm2, %v9714_v59, 0.0  ;;  %v8053_v55 = vld [vmem:[%s11424_s6 + $0x3] ss:$0 sm:$0xff] }
 0x28d   :  { %9719 = vpow2.f32 %v2698_v15  ;;  %2712 = vadd.xlane.f32.xlu1 %v2711_v41 }
 0x28e   :  { %9721 = vpow2.f32 %v2700_v14 }
 0x28f   :  { %v10666_v48 = vpop.eup %9715 }
 0x290   :  { %v10668_v22 = vpop.eup %9717  ;;  %v2714_v24 = vsel %vm2037_vm2, %v10666_v48, 0.0 }
 0x291   :  { %v2717_v5 = vsel %vm2037_vm2, %v10668_v22, 0.0  ;;  %2715 = vadd.xlane.f32.xlu0 %v2714_v24 }
 0x292   :  { %2718 = vadd.xlane.f32.xlu1 %v2717_v5 }
 0x297   :  { %v10674_v58 = vpop.eup %9719 }
 0x298   :  { %v10676_v49 = vpop.eup %9721  ;;  %v2720_v42 = vsel %vm2037_vm2, %v10674_v58, 0.0 }
 0x299   :  { %v2723_v61 = vsel %vm2037_vm2, %v10676_v49, 0.0  ;;  %2721 = vadd.xlane.f32.xlu0 %v2720_v42  ;;  %v1824_v42 = vadd.f32 %v8054_v34, %v10646_v39  ;;  %v8056_v39 = vld [vmem:[%s11424_s6 + $0x6] ss:$0 sm:$0xff] }
 0x29a   :  { %2724 = vadd.xlane.f32.xlu1 %v2723_v61  ;;  %v181_v34 = vld [vmem:[%s11425_s7 + $0x20] sm:$0xff] }
 0x30e   :  { %v2704_v2 = vpop.xlane.xlu0 %2703 }
 0x30f   :  { %9723 = vrcp.f32 %v2704_v2 }
 0x312   :  { %v2707_v18 = vpop.xlane.xlu1 %2706 }
 0x313   :  { %9725 = vrcp.f32 %v2707_v18 }
 0x316   :  { %v2710_v10 = vpop.xlane.xlu0 %2709 }
 0x317   :  { %9727 = vrcp.f32 %v2710_v10 }
 0x319   :  { %v9724_v53 = vpop.eup %9723 }
 0x31a   :  { %v2734_v33 = vmul.f32 %v9724_v53, %v9708_v43  ;;  %v2713_v52 = vpop.xlane.xlu1 %2712  ;;  %v1754_v43 = vadd.f32 %v8053_v55, %v10644_v29  ;;  %v8055_v29 = vld [vmem:[%s11424_s6 + $0x5] ss:$0 sm:$0xff]  ;;  %v8057_v53 = vld [vmem:[%s11424_s6 + $0x7] ss:$0 sm:$0xff] }
 0x31b   :  { %9729 = vrcp.f32 %v2713_v52  ;;  %v177_v55 = vld [vmem:[%s11425_s7] sm:$0xff] }
 0x31c   :  { %8844 = vmatmul.mubr.msk.f32.vlgmr.msra.gmra.mrb[34].mxu0 %vm2037_vm2, %v2734_v33  ;;  %v1964_v33 = vadd.f32 %v8056_v39, %v10648_v0 }
 0x31d   :  { %v9726_v15 = vpop.eup %9725  ;;  %8852 = vmatpush3.msra.mxu0 %v1684_v3  ;;  %8853 = vmatprep.mubr.msk.f32.mxu0 %vm9853_vm0, %v11476_v23  ;;  %v2034_v3 = vadd.f32 %v8057_v53, %v10652_v11 }
 0x31e   :  { %v2735_v14 = vmul.f32 %v9726_v15, %v9710_v40  ;;  %v2716_v41 = vpop.xlane.xlu0 %2715  ;;  %8861 = vmatprep.subr.mxu0 %v11476_v23 }
 0x31f   :  { %v2719_v24 = vpop.xlane.xlu1 %2718  ;;  %9731 = vrcp.f32 %v2716_v41  ;;  %v180_v41 = vld [vmem:[%s11425_s7 + $0x18] sm:$0xff] }
 0x320   :  { %9733 = vrcp.f32 %v2719_v24  ;;  %8849 = vmatmul.mubr.msk.f32.vlgmr.msra.gmra.mrb[30].mxu1 %vm2037_vm2, %v2735_v14 }
 0x321   :  { %v9728_v5 = vpop.eup %9727  ;;  %8857 = vmatpush3.msra.mxu1 %v1754_v43  ;;  %8858 = vmatprep.mubr.msk.f32.mxu1 %vm9853_vm0, %v11476_v23 }
 0x322   :  { %v2736_v40 = vmul.f32 %v9728_v5, %v9712_v30  ;;  %8866 = vmatprep.subr.mxu1 %v11476_v23  ;;  %v1894_v30 = vadd.f32 %v8055_v29, %v10650_v9 }
 0x324   :  { %8854 = vmatmul.mubr.msk.f32.vlgmr.msra.gmra.mrb[36].mxu0 %vm2037_vm2, %v2736_v40 }
 0x325   :  { %v9730_v61 = vpop.eup %9729  ;;  %8862 = vmatpush3.msra.mxu0 %v1824_v42  ;;  %8863 = vmatprep.mubr.msk.f32.mxu0 %vm9853_vm0, %v11476_v23  ;;  %v182_v42 = vld [vmem:[%s11425_s7 + $0x28] sm:$0xff] }
 0x326   :  { %v2737_v2 = vmul.f32 %v9730_v61, %v9714_v59  ;;  %v2722_v18 = vpop.xlane.xlu0 %2721  ;;  %8871 = vmatprep.subr.mxu0 %v11476_v23 }
 0x327   :  { %v2725_v10 = vpop.xlane.xlu1 %2724  ;;  %9735 = vrcp.f32 %v2722_v18 }
 0x328   :  { %9737 = vrcp.f32 %v2725_v10  ;;  %8859 = vmatmul.mubr.msk.f32.vlgmr.msra.gmra.mrb[32].mxu1 %vm2037_vm2, %v2737_v2  ;;  %v183_v2 = vld [vmem:[%s11425_s7 + $0x30] sm:$0xff] }
 0x329   :  { %v9732_v21 = vpop.eup %9731  ;;  %8867 = vmatpush3.msra.mxu1 %v1894_v30  ;;  %8868 = vmatprep.mubr.msk.f32.mxu1 %vm9853_vm0, %v11476_v23  ;;  %v184_v30 = vld [vmem:[%s11425_s7 + $0x38] sm:$0xff] }
 0x32a   :  { %v9734_v59 = vpop.eup %9733  ;;  %v2738_v9 = vmul.f32 %v9732_v21, %v10666_v48  ;;  %8876 = vmatprep.subr.mxu1 %v11476_v23 }
 0x32b   :  { %v2739_v52 = vmul.f32 %v9734_v59, %v10668_v22 }
 0x32c   :  { %8864 = vmatmul.mubr.msk.f32.vlgmr.msra.gmra.mrb[38].mxu0 %vm2037_vm2, %v2738_v9 }
 0x32d   :  { %8869 = vmatmul.mubr.msk.f32.vlgmr.msra.gmra.mrb[34].mxu1 %vm2037_vm2, %v2739_v52  ;;  %8872 = vmatpush3.msra.mxu0 %v1964_v33 }
 0x32e   :  { %8877 = vmatpush3.msra.mxu1 %v2034_v3  ;;  %8873 = vmatprep.mubr.msk.f32.mxu0 %vm9853_vm0, %v11476_v23 }
 0x32f   :  { %8878 = vmatprep.mubr.msk.f32.mxu1 %vm9853_vm0, %v11476_v23  ;;  %8881 = vmatprep.subr.mxu0 %v11476_v23 }
 0x330   :  { %8886 = vmatprep.subr.mxu1 %v11476_v23 }
 0x331   :  { %v9736_v0 = vpop.eup %9735 }
 0x332   :  { %v9738_v48 = vpop.eup %9737  ;;  %v2740_v11 = vmul.f32 %v9736_v0, %v10674_v58  ;;  %v178_v58 = vld [vmem:[%s11425_s7 + $0x8] sm:$0xff] }
 0x333   :  { %v2741_v22 = vmul.f32 %v9738_v48, %v10676_v49  ;;  %v179_v49 = vld [vmem:[%s11425_s7 + $0x10] sm:$0xff] }
 0x334   :  { %8874 = vmatmul.mubr.msk.f32.vlgmr.msra.gmra.mrb[40].mxu0 %vm2037_vm2, %v2740_v11 }
 0x335   :  { %8879 = vmatmul.mubr.msk.f32.vlgmr.msra.gmra.mrb[36].mxu1 %vm2037_vm2, %v2741_v22  ;;  %8883 = vmatprep.mubr.msk.f32.mxu0 %vm9853_vm0, %v11476_v23 }
 0x336   :  { %8888 = vmatprep.mubr.msk.f32.mxu1 %vm9853_vm0, %v11476_v23  ;;  %8882 = vmatpush3.msra.mxu0 %v177_v55 }
 0x337   :  { %8891 = vmatprep.subr.mxu0 %v11476_v23  ;;  %8887 = vmatpush3.msra.mxu1 %v178_v58 }
 0x338   :  { %8896 = vmatprep.subr.mxu1 %v11476_v23 }
 0x3ef   :  { %v2811_v15 = vpop.f32.mrb[34].mxu0 }
 0x3f0   :  { %v8845_v14 = vpop.f32.mrb[35].mxu0  ;;  %8884 = vmatmul.mubr.msk.f32.vlgmr.msra.gmra.mrb[42].mxu0 %vm2037_vm2, %v2811_v15 }
 0x3f1   :  { %8892 = vmatpush3.msra.mxu0 %v179_v49  ;;  %8893 = vmatprep.mubr.msk.f32.mxu0 %vm9853_vm0, %v11476_v23 }
 0x3f2   :  { %8901 = vmatprep.subr.mxu0 %v11476_v23 }
 0x3f3   :  { %v2884_v43 = vpop.f32.mrb[30].mxu1 }
 0x3f4   :  { %v8850_v24 = vpop.f32.mrb[31].mxu1  ;;  %8889 = vmatmul.mubr.msk.f32.vlgmr.msra.gmra.mrb[38].mxu1 %vm2037_vm2, %v2884_v43  ;;  %v8098_v43 = vld [vmem:[%s11426_s8] ss:$0 sm:$0xff] }
 0x3f5   :  { %8897 = vmatpush3.msra.mxu1 %v180_v41  ;;  %8898 = vmatprep.mubr.msk.f32.mxu1 %vm9853_vm0, %v11476_v23 }
 0x3f6   :  { %8906 = vmatprep.subr.mxu1 %v11476_v23 }
 0x3f7   :  { %v2957_v5 = vpop.f32.mrb[36].mxu0 }
 0x3f8   :  { %v8855_v40 = vpop.f32.mrb[37].mxu0  ;;  %8894 = vmatmul.mubr.msk.f32.vlgmr.msra.gmra.mrb[44].mxu0 %vm2037_vm2, %v2957_v5 }
 0x3f9   :  { %8902 = vmatpush3.msra.mxu0 %v181_v34  ;;  %8903 = vmatprep.mubr.msk.f32.mxu0 %vm9853_vm0, %v11476_v23 }
 0x3fa   :  { %8911 = vmatprep.subr.mxu0 %v11476_v23 }
 0x3fb   :  { %v3030_v29 = vpop.f32.mrb[32].mxu1 }
 0x3fc   :  { %v8860_v61 = vpop.f32.mrb[33].mxu1  ;;  %8899 = vmatmul.mubr.msk.f32.vlgmr.msra.gmra.mrb[40].mxu1 %vm2037_vm2, %v3030_v29 }
 0x3fd   :  { %8907 = vmatpush3.msra.mxu1 %v182_v42  ;;  %8908 = vmatprep.mubr.msk.f32.mxu1 %vm9853_vm0, %v11476_v23 }
 0x3fe   :  { %8916 = vmatprep.subr.mxu1 %v11476_v23 }
 0x3ff   :  { %v3103_v18 = vpop.f32.mrb[38].mxu0 }
 0x400   :  { %v3176_v10 = vpop.f32.mrb[34].mxu1  ;;  %v8865_v39 = vpop.f32.mrb[39].mxu0  ;;  %8904 = vmatmul.mubr.msk.f32.vlgmr.msra.gmra.mrb[46].mxu0 %vm2037_vm2, %v3103_v18 }
 0x401   :  { %v8870_v21 = vpop.f32.mrb[35].mxu1  ;;  %8909 = vmatmul.mubr.msk.f32.vlgmr.msra.gmra.mrb[42].mxu1 %vm2037_vm2, %v3176_v10  ;;  %8912 = vmatpush3.msra.mxu0 %v183_v2  ;;  %v9787_v10 = vld [vmem:[%s11460_s22] sm:$0xff] }
 0x402   :  { %8913 = vmatprep.mubr.msk.f32.mxu0 %vm9853_vm0, %v11476_v23  ;;  %8917 = vmatpush3.msra.mxu1 %v184_v30 }
 0x403   :  { %8918 = vmatprep.mubr.msk.f32.mxu1 %vm9853_vm0, %v11476_v23 }
 0x407   :  { %v3249_v53 = vpop.f32.mrb[40].mxu0 }
 0x408   :  { %v3322_v59 = vpop.f32.mrb[36].mxu1  ;;  %v8875_v9 = vpop.f32.mrb[41].mxu0  ;;  %8914 = vmatmul.mubr.msk.f32.vlgmr.msra.gmra.mrb[48].mxu0 %vm2037_vm2, %v3249_v53 }
 0x409   :  { %v8880_v33 = vpop.f32.mrb[37].mxu1  ;;  %8919 = vmatmul.mubr.msk.f32.vlgmr.msra.gmra.mrb[44].mxu1 %vm2037_vm2, %v3322_v59 }
 0x4c3   :  { %v3395_v52 = vpop.f32.mrb[42].mxu0 }
 0x4c4   :  { %v8885_v3 = vpop.f32.mrb[43].mxu0  ;;  %v3910_v48 = vsel %vm254_vm1, %v3395_v52, 0.0 }
 0x4c7   :  { %v3468_v0 = vpop.f32.mrb[38].mxu1 }
 0x4c8   :  { %v3911_v11 = vsel %vm254_vm1, %v3468_v0, 0.0  ;;  %v8890_v22 = vpop.f32.mrb[39].mxu1 }
 0x4c9   :  { %v3912_v55 = vadd.f32 %v3911_v11, %v3910_v48 }
 0x4cb   :  { %v3541_v58 = vpop.f32.mrb[44].mxu0 }
 0x4cc   :  { %v3913_v49 = vsel %vm254_vm1, %v3541_v58, 0.0  ;;  %v8895_v15 = vpop.f32.mrb[45].mxu0 }
 0x4cd   :  { %v3914_v14 = vadd.f32 %v3913_v49, %v3912_v55  ;;  %v9788_v55 = vld [vmem:[%s11460_s22 + $0x8] sm:$0xff] }
 0x4cf   :  { %v3614_v41 = vpop.f32.mrb[40].mxu1 }
 0x4d0   :  { %v3915_v24 = vsel %vm254_vm1, %v3614_v41, 0.0  ;;  %v8900_v34 = vpop.f32.mrb[41].mxu1 }
 0x4d1   :  { %v3916_v5 = vadd.f32 %v3915_v24, %v3914_v14 }
 0x4d3   :  { %v3930_v40 = vadd.f32 %v8098_v43, %v3916_v5  ;;  %v3687_v42 = vpop.f32.mrb[46].mxu0 }
 0x4d4   :  { %v3917_v29 = vsel %vm254_vm1, %v3687_v42, 0.0  ;;  %v3760_v61 = vpop.f32.mrb[42].mxu1  ;;  %v8905_v2 = vpop.f32.mrb[47].mxu0 }
 0x4d5   :  { %v3918_v18 = vsel %vm254_vm1, %v3760_v61, 0.0  ;;  %v8910_v30 = vpop.f32.mrb[43].mxu1  ;;  %v3932_v39 = vadd.f32 %v9787_v10, %v3930_v40  ;;  %v186_v61 = vld [vmem:[%s11427_s9] sm:$0xff]  ;;  %v187_v2 = vld [vmem:[%s11427_s9 + $0x8] sm:$0xff]  ;;  %v189_v10 = vld [vmem:[%s11427_s9 + $0x18] sm:$0xff] }
 0x4d6   :  { %v3919_v21 = vadd.f32 %v3918_v18, %v3917_v29  ;;  %v10817_v18 = vpack.c.bf16 %v187_v2, %v186_v61  ;;  %v188_v30 = vld [vmem:[%s11427_s9 + $0x10] sm:$0xff] }
 0x4d7   :  { %v3934_v53 = vsel %vm254_vm1, %v3932_v39, 0.0 }
 0x4d8   :  { %3935 = vadd.xlane.f32.xlu0 %v3934_v53  ;;  %9510 = vmatprep.subr.bf16.mxu0 %v10817_v18  ;;  %v192_v53 = vld [vmem:[%s11429_s11 + $0x8] sm:$0xff] }
 0x4d9   :  { %9512 = vmatpush3.bf16.msra.mxu0 %v10817_v18 }
 0x4db   :  { %v3833_v59 = vpop.f32.mrb[48].mxu0 }
 0x4dc   :  { %v3920_v9 = vsel %vm254_vm1, %v3833_v59, 0.0  ;;  %v3906_v33 = vpop.f32.mrb[44].mxu1  ;;  %v8915_v52 = vpop.f32.mrb[49].mxu0  ;;  %v193_v59 = vld [vmem:[%s11429_s11 + $0x10] sm:$0xff] }
 0x4dd   :  { %v3921_v3 = vadd.f32 %v3920_v9, %v3919_v21  ;;  %v8920_v0 = vpop.f32.mrb[45].mxu1  ;;  %v3922_v48 = vsel %vm254_vm1, %v3906_v33, 0.0  ;;  %v191_v21 = vld [vmem:[%s11429_s11] sm:$0xff]  ;;  %v11477_v9 = vmov 0.0|0.0   ;;  %v194_v52 = vld [vmem:[%s11429_s11 + $0x18] sm:$0xff] }
 0x4de   :  { %v10841_v33 = vpack.c.bf16 %v192_v53, %v191_v21  ;;  %v195_v0 = vld [vmem:[%s11429_s11 + $0x20] sm:$0xff] }
 0x4df   :  { %v3923_v11 = vadd.f32 %v3922_v48, %v3921_v3  ;;  %v10846_v3 = vpack.c.bf16 %v194_v52, %v193_v59  ;;  %v196_v48 = vld [vmem:[%s11429_s11 + $0x28] sm:$0xff] }
 0x4e0   :  { %9518 = vmatprep.subr.bf16.mxu1 %v10841_v33 }
 0x4e1   :  { %v3931_v22 = vadd.f32 %v8098_v43, %v3923_v11  ;;  %9520 = vmatpush3.bf16.msra.mxu1 %v10841_v33  ;;  %v10857_v11 = vpack.c.bf16 %v196_v48, %v195_v0 }
 0x4e2   :  { %9522 = vmatprep.subr.bf16.mxu1 %v10846_v3 }
 0x4e3   :  { %v3933_v58 = vadd.f32 %v9788_v55, %v3931_v22 }
 0x4e5   :  { %v3937_v49 = vsel %vm254_vm1, %v3933_v58, 0.0  ;;  %9524 = vmatpush3.bf16.msra.mxu1 %v10846_v3 }
 0x4e6   :  { %3938 = vadd.xlane.f32.xlu1 %v3937_v49  ;;  %9526 = vmatprep.subr.bf16.mxu1 %v10857_v11 }
 0x4e9   :  { %9528 = vmatpush3.bf16.msra.mxu1 %v10857_v11 }
 0x565   :  { %v3936_v15 = vpop.xlane.xlu0 %3935 }
 0x566   :  { %v3941_v14 = vmul.f32 0.03125, %v3936_v15 }
 0x568   :  { %v3943_v41 = vsub.f32 %v3932_v39, %v3941_v14  ;;  %v10827_v39 = vpack.c.bf16 %v189_v10, %v188_v30 }
 0x56a   :  { %v3945_v24 = vmul.f32 %v3943_v41, %v3943_v41  ;;  %9514 = vmatprep.subr.bf16.mxu0 %v10827_v39 }
 0x56b   :  { %9516 = vmatpush3.bf16.msra.mxu0 %v10827_v39 }
 0x56c   :  { %v3947_v34 = vsel %vm254_vm1, %v3945_v24, 0.0  ;;  %9533 = vmatprep.subr.bf16.mxu0 %v11477_v9  ;;  %v8099_v24 = vld [vmem:[%s11431_s13] ss:$0 sm:$0xff] }
 0x56d   :  { %3948 = vadd.xlane.f32.xlu0 %v3947_v34 }
 0x573   :  { %v3939_v5 = vpop.xlane.xlu1 %3938 }
 0x574   :  { %v3942_v40 = vmul.f32 0.03125, %v3939_v5 }
 0x576   :  { %v3944_v42 = vsub.f32 %v3933_v58, %v3942_v40  ;;  %v8100_v40 = vld [vmem:[%s11432_s14] ss:$0 sm:$0xff] }
 0x578   :  { %v3946_v29 = vmul.f32 %v3944_v42, %v3944_v42 }
 0x57a   :  { %v3950_v43 = vsel %vm254_vm1, %v3946_v29, 0.0 }
 0x57b   :  { %3951 = vadd.xlane.f32.xlu1 %v3950_v43 }
 0x5fa   :  { %v3949_v22 = vpop.xlane.xlu0 %3948 }
 0x5fb   :  { %v3953_v55 = vmul.f32 0.03125, %v3949_v22  ;;  %v8104_v22 = vld [vmem:[%s11430_s12] ss:$0 sm:$0xff] }
 0x5fd   :  { %v3955_v58 = vadd.f32 1e-05, %v3953_v55 }
 0x5ff   :  { %9739 = vrsqrt.f32 %v3955_v58 }
 0x608   :  { %v3952_v49 = vpop.xlane.xlu1 %3951 }
 0x609   :  { %v9740_v15 = vpop.eup %9739  ;;  %v3954_v14 = vmul.f32 0.03125, %v3952_v49 }
 0x60a   :  { %v3959_v34 = vmul.f32 %v9740_v15, %v3943_v41  ;;  %v197_v41 = vld [vmem:[%s11429_s11 + $0x30] sm:$0xff] }
 0x60b   :  { %v3956_v5 = vadd.f32 1e-05, %v3954_v14 }
 0x60c   :  { %v3967_v29 = vmul.f32 %v8099_v24, %v3959_v34 }
 0x60d   :  { %9741 = vrsqrt.f32 %v3956_v5 }
 0x60e   :  { %v3975_v43 = vadd.f32 %v8100_v40, %v3967_v29 }
 0x610   :  { %8929 = vmatprep.mubr.msk.f32.mxu0 %vm254_vm1, %v3975_v43 }
 0x617   :  { %v9742_v61 = vpop.eup %9741 }
 0x618   :  { %v3960_v2 = vmul.f32 %v9742_v61, %v3944_v42  ;;  %v198_v42 = vld [vmem:[%s11429_s11 + $0x38] sm:$0xff] }
 0x619   :  { %v10882_v21 = vpack.c.bf16 %v198_v42, %v197_v41 }
 0x61a   :  { %v3968_v30 = vmul.f32 %v8099_v24, %v3960_v2 }
 0x61b   :  { %9530 = vmatprep.subr.bf16.mxu1 %v10882_v21 }
 0x61c   :  { %v3976_v10 = vadd.f32 %v8100_v40, %v3968_v30  ;;  %9532 = vmatpush3.bf16.msra.mxu1 %v10882_v21 }
 0x61d   :  { %9545 = vmatprep.subr.bf16.mxu1 %v11477_v9 }
 0x61e   :  { %8930 = vmatmul.mubr.msk.f32.vlgmr.msra.gmra.mrb[50].mxu0 %vm254_vm1, %v3976_v10 }
 0x61f   :  { %9535 = vmatpush3.bf16.msra.mxu0 %v9959_v4  ;;  %8959 = vmatprep.mubr.msk.f32.mxu0 %vm9853_vm0, %v11476_v23  ;;  %v8101_v4 = vld [vmem:[%s11428_s10] ss:$0 sm:$0xff] }
 0x620   :  { %9536 = vmatprep.subr.bf16.mxu0 %v11477_v9 }
 0x623   :  { %9538 = vmatpush3.bf16.msra.mxu0 %v9983_v12 }
 0x624   :  { %9539 = vmatprep.subr.bf16.mxu0 %v11477_v9 }
 0x6f1   :  { %v8931_v12 = vpop.f32.mrb[50].mxu0 }
 0x6f2   :  { %v4061_v53 = vadd.f32 %v8931_v12, %v8101_v4  ;;  %v4055_v59 = vpop.f32.mrb[51].mxu0 }
 0x6f3   :  { %v4056_v52 = vadd.f32 %v8101_v4, %v4055_v59 }
 0x6f4   :  { %v4065_v48 = vmax.f32 %v4061_v53, 0.0 }
 0x6f5   :  { %v4064_v0 = vmax.f32 %v4056_v52, 0.0 }
 0x6f7   :  { %8948 = vmatprep.mubr.msk.f32.mxu1 %vm4072_vm3, %v4064_v0 }
 0x6f8   :  { %8949 = vmatmul.mubr.msk.f32.vlgmr.msra.gmra.mrb[46].mxu1 %vm4072_vm3, %v4065_v48  ;;  %v8107_v48 = vld [vmem:[%s11433_s15] ss:$0 sm:$0xff] }
 0x6f9   :  { %9547 = vmatpush3.bf16.msra.mxu1 %v10008_v19  ;;  %8981 = vmatprep.mubr.msk.f32.mxu1 %vm9853_vm0, %v11476_v23 }
 0x6fa   :  { %9548 = vmatprep.subr.bf16.mxu1 %v11477_v9 }
 0x6fd   :  { %9550 = vmatpush3.bf16.msra.mxu1 %v10032_v25 }
 0x6fe   :  { %9557 = vmatprep.subr.bf16.mxu1 %v11477_v9 }
 0x7cb   :  { %v8950_v55 = vpop.f32.mrb[46].mxu1 }
 0x7cc   :  { %v4151_v58 = vadd.f32 %v8950_v55, %v8104_v22  ;;  %v4145_v49 = vpop.f32.mrb[47].mxu1 }
 0x7cd   :  { %v4146_v15 = vadd.f32 %v8104_v22, %v4145_v49 }
 0x7ce   :  { %v4155_v14 = vadd.f32 %v4151_v58, %v3976_v10  ;;  %v8108_v58 = vld [vmem:[%s11434_s16] ss:$0 sm:$0xff] }
 0x7cf   :  { %v4154_v24 = vadd.f32 %v4146_v15, %v3975_v43 }
 0x7d0   :  { %v4159_v19 = vsel %vm254_vm1, %v4155_v14, 0.0 }
 0x7d1   :  { %4160 = vadd.xlane.f32.xlu1 %v4159_v19  ;;  %v4156_v34 = vsel %vm254_vm1, %v4154_v24, 0.0 }
 0x7d2   :  { %4157 = vadd.xlane.f32.xlu0 %v4156_v34 }
 0x85e   :  { %v4161_v5 = vpop.xlane.xlu1 %4160 }
 0x85f   :  { %v4163_v25 = vmul.f32 0.03125, %v4161_v5  ;;  %v4158_v40 = vpop.xlane.xlu0 %4157 }
 0x860   :  { %v4162_v29 = vmul.f32 0.03125, %v4158_v40  ;;  %v9790_v40 = vld [vmem:[%s11420_s2] ss:$0 sm:$0xff] }
 0x861   :  { %v4165_v61 = vsub.f32 %v4155_v14, %v4163_v25 }
 0x862   :  { %v4164_v2 = vsub.f32 %v4154_v24, %v4162_v29 }
 0x863   :  { %v4167_v30 = vmul.f32 %v4165_v61, %v4165_v61 }
 0x864   :  { %v4166_v41 = vmul.f32 %v4164_v2, %v4164_v2 }
 0x865   :  { %v4171_v42 = vsel %vm254_vm1, %v4167_v30, 0.0  ;;  %v9791_v30 = vld [vmem:[%s11422_s4 + $0x2] ss:$0 sm:$0xff] }
 0x866   :  { %4172 = vadd.xlane.f32.xlu1 %v4171_v42  ;;  %v4168_v10 = vsel %vm254_vm1, %v4166_v41, 0.0 }
 0x867   :  { %4169 = vadd.xlane.f32.xlu0 %v4168_v10 }
 0x8f3   :  { %v4173_v43 = vpop.xlane.xlu1 %4172 }
 0x8f4   :  { %v4175_v4 = vmul.f32 0.03125, %v4173_v43  ;;  %v4170_v12 = vpop.xlane.xlu0 %4169  ;;  %v9792_v43 = vld [vmem:[%s11420_s2 + $0x2] ss:$0 sm:$0xff] }
 0x8f5   :  { %v4174_v53 = vmul.f32 0.03125, %v4170_v12 }
 0x8f6   :  { %v4177_v59 = vadd.f32 1e-05, %v4175_v4 }
 0x8f7   :  { %v4176_v52 = vadd.f32 1e-05, %v4174_v53 }
 0x8f9   :  { %9743 = vrsqrt.f32 %v4176_v52 }
 0x8fa   :  { %9745 = vrsqrt.f32 %v4177_v59  ;;  %v9793_v59 = vld [vmem:[%s11422_s4 + $0x1] ss:$0 sm:$0xff] }
 0x903   :  { %v9744_v0 = vpop.eup %9743 }
 0x904   :  { %v4180_v22 = vmul.f32 %v9744_v0, %v4164_v2  ;;  %v9746_v55 = vpop.eup %9745  ;;  %v9794_v0 = vld [vmem:[%s11422_s4 + $0x4] ss:$0 sm:$0xff] }
 0x905   :  { %v4181_v15 = vmul.f32 %v9746_v55, %v4165_v61 }
 0x906   :  { %v4188_v49 = vmul.f32 %v8107_v48, %v4180_v22 }
 0x907   :  { %v4189_v24 = vmul.f32 %v8107_v48, %v4181_v15  ;;  %v9796_v15 = vld [vmem:[%s11420_s2 + $0x4] ss:$0 sm:$0xff] }
 0x908   :  { %v10911_v14 = vadd.f32 %v8108_v58, %v4188_v49 }
 0x909   :  { %v10927_v19 = vadd.f32 %v8108_v58, %v4189_v24  ;;  %v9795_v58 = vld [vmem:[%s11420_s2 + $0x1] ss:$0 sm:$0xff] }
 0x90a   :  { %8960 = vmatmul.mubr.msk.f32.vlgmr.msra.gmra.mrb[52].mxu0 %vm254_vm1, %v10911_v14  ;;  %8982 = vmatmul.mubr.msk.f32.vlgmr.msra.gmra.mrb[48].mxu1 %vm254_vm1, %v10911_v14 }
 0x90b   :  { %9541 = vmatpush3.bf16.msra.mxu0 %v9970_v8  ;;  %9559 = vmatpush3.bf16.msra.mxu1 %v10056_v31  ;;  %v11478_v8 = vld [vmem:[#allocation7_spill] sm:$0xff] }
 0x90c   :  { %9542 = vmatprep.subr.bf16.mxu0 %v11477_v9  ;;  %9560 = vmatprep.subr.bf16.mxu1 %v11477_v9  ;;  %v11482_v31 = vld [vmem:[#allocation11_spill] sm:$0xff] }
 0x90d   :  { %8970 = vmatprep.mubr.msk.f32.mxu0 %vm9853_vm0, %v11476_v23  ;;  %9003 = vmatprep.mubr.msk.f32.mxu1 %vm9853_vm0, %v11476_v23 }
 0x90f   :  { %9544 = vmatpush3.bf16.msra.mxu0 %v9987_v13  ;;  %9562 = vmatpush3.bf16.msra.mxu1 %v10080_v37  ;;  %v11479_v13 = vld [vmem:[#allocation5_spill] sm:$0xff] }
 0x910   :  { %9551 = vmatprep.subr.bf16.mxu0 %v11477_v9  ;;  %9569 = vmatprep.subr.bf16.mxu1 %v11477_v9  ;;  %v11484_v37 = vld [vmem:[#allocation13_spill] sm:$0xff] }
 0x912   :  { %8971 = vmatmul.mubr.msk.f32.vlgmr.msra.gmra.mrb[54].mxu0 %vm254_vm1, %v10911_v14  ;;  %9004 = vmatmul.mubr.msk.f32.vlgmr.msra.gmra.mrb[50].mxu1 %vm254_vm1, %v10927_v19 }
 0x913   :  { %9553 = vmatpush3.bf16.msra.mxu0 %v10012_v20  ;;  %9571 = vmatpush3.bf16.msra.mxu1 %v10109_v44  ;;  %v11480_v20 = vld [vmem:[#allocation9_spill] sm:$0xff]  ;;  %v11486_v44 = vld [vmem:[#allocation15_spill] sm:$0xff] }
 0x914   :  { %9554 = vmatprep.subr.bf16.mxu0 %v11477_v9  ;;  %9572 = vmatprep.subr.bf16.mxu1 %v11477_v9 }
 0x915   :  { %8992 = vmatprep.mubr.msk.f32.mxu0 %vm9853_vm0, %v11476_v23  ;;  %9025 = vmatprep.mubr.msk.f32.mxu1 %vm9853_vm0, %v11476_v23 }
 0x917   :  { %9556 = vmatpush3.bf16.msra.mxu0 %v10036_v26  ;;  %9574 = vmatpush3.bf16.msra.mxu1 %v10133_v50  ;;  %v11481_v26 = vld [vmem:[#allocation6_spill] sm:$0xff]  ;;  %v11488_v50 = vld [vmem:[#allocation17_spill] sm:$0xff] }
 0x918   :  { %9563 = vmatprep.subr.bf16.mxu0 %v11477_v9  ;;  %9581 = vmatprep.subr.bf16.mxu1 %v11477_v9 }
 0x91a   :  { %8993 = vmatmul.mubr.msk.f32.vlgmr.msra.gmra.mrb[56].mxu0 %vm254_vm1, %v10911_v14  ;;  %9026 = vmatmul.mubr.msk.f32.vlgmr.msra.gmra.mrb[52].mxu1 %vm254_vm1, %v10927_v19 }
 0x91b   :  { %9565 = vmatpush3.bf16.msra.mxu0 %v10060_v32  ;;  %9583 = vmatpush3.bf16.msra.mxu1 %v10157_v56  ;;  %v11483_v32 = vld [vmem:[#allocation8_spill] sm:$0xff] }
 0x91c   :  { %9566 = vmatprep.subr.bf16.mxu0 %v11477_v9  ;;  %9584 = vmatprep.subr.bf16.mxu1 %v11477_v9  ;;  %v11490_v56 = vld [vmem:[#allocation16_spill] sm:$0xff] }
 0x91d   :  { %9014 = vmatprep.mubr.msk.f32.mxu0 %vm9853_vm0, %v11476_v23  ;;  %9047 = vmatprep.mubr.msk.f32.mxu1 %vm9853_vm0, %v11476_v23 }
 0x91f   :  { %9568 = vmatpush3.bf16.msra.mxu0 %v10084_v38  ;;  %9586 = vmatpush3.bf16.msra.mxu1 %v10181_v62  ;;  %v11485_v38 = vld [vmem:[#allocation10_spill] sm:$0xff]  ;;  %v11492_v62 = vld [vmem:[#allocation19_spill] sm:$0xff] }
 0x920   :  { %9575 = vmatprep.subr.bf16.mxu0 %v11477_v9  ;;  %9593 = vmatprep.subr.bf16.mxu1 %v11477_v9 }
 0x922   :  { %9015 = vmatmul.mubr.msk.f32.vlgmr.msra.gmra.mrb[58].mxu0 %vm254_vm1, %v10927_v19  ;;  %9048 = vmatmul.mubr.msk.f32.vlgmr.msra.gmra.mrb[54].mxu1 %vm254_vm1, %v10911_v14 }
 0x923   :  { %9577 = vmatpush3.bf16.msra.mxu0 %v10113_v45  ;;  %9595 = vmatpush3.bf16.msra.mxu1 %v10205_v6  ;;  %v11487_v45 = vld [vmem:[#allocation12_spill] sm:$0xff] }
 0x924   :  { %9578 = vmatprep.subr.bf16.mxu0 %v11477_v9  ;;  %9596 = vmatprep.subr.bf16.mxu1 %v11477_v9 }
 0x925   :  { %9036 = vmatprep.mubr.msk.f32.mxu0 %vm9853_vm0, %v11476_v23  ;;  %9069 = vmatprep.mubr.msk.f32.mxu1 %vm9853_vm0, %v11476_v23 }
 0x927   :  { %9580 = vmatpush3.bf16.msra.mxu0 %v10137_v51  ;;  %9598 = vmatpush3.bf16.msra.mxu1 %v10229_v16  ;;  %v11489_v51 = vld [vmem:[#allocation14_spill] sm:$0xff] }
 0x928   :  { %9587 = vmatprep.subr.bf16.mxu0 %v11477_v9  ;;  %9605 = vmatprep.subr.bf16.mxu1 %v11477_v9 }
 0x92a   :  { %9037 = vmatmul.mubr.msk.f32.vlgmr.msra.gmra.mrb[60].mxu0 %vm254_vm1, %v10927_v19  ;;  %9070 = vmatmul.mubr.msk.f32.vlgmr.msra.gmra.mrb[56].mxu1 %vm254_vm1, %v10911_v14 }
 0x92b   :  { %9589 = vmatpush3.bf16.msra.mxu0 %v10161_v57  ;;  %9607 = vmatpush3.bf16.msra.mxu1 %v10253_v27  ;;  %v11491_v57 = vld [vmem:[#allocation18_spill] sm:$0xff] }
 0x92c   :  { %9590 = vmatprep.subr.bf16.mxu0 %v11477_v9  ;;  %9608 = vmatprep.subr.bf16.mxu1 %v11477_v9 }
 0x92d   :  { %9058 = vmatprep.mubr.msk.f32.mxu0 %vm9853_vm0, %v11476_v23  ;;  %9091 = vmatprep.mubr.msk.f32.mxu1 %vm9853_vm0, %v11476_v23 }
 0x92f   :  { %9592 = vmatpush3.bf16.msra.mxu0 %v10185_v63  ;;  %9610 = vmatpush3.bf16.msra.mxu1 %v10277_v35 }
 0x930   :  { %9599 = vmatprep.subr.bf16.mxu0 %v11477_v9  ;;  %9617 = vmatprep.subr.bf16.mxu1 %v11477_v9 }
 0x932   :  { %9059 = vmatmul.mubr.msk.f32.vlgmr.msra.gmra.mrb[62].mxu0 %vm254_vm1, %v10911_v14  ;;  %9092 = vmatmul.mubr.msk.f32.vlgmr.msra.gmra.mrb[58].mxu1 %vm254_vm1, %v10927_v19 }
 0x933   :  { %9601 = vmatpush3.bf16.msra.mxu0 %v10209_v7  ;;  %9619 = vmatpush3.bf16.msra.mxu1 %v10301_v46 }
 0x934   :  { %9602 = vmatprep.subr.bf16.mxu0 %v11477_v9  ;;  %9620 = vmatprep.subr.bf16.mxu1 %v11477_v9 }
 0x935   :  { %9080 = vmatprep.mubr.msk.f32.mxu0 %vm9853_vm0, %v11476_v23  ;;  %9113 = vmatprep.mubr.msk.f32.mxu1 %vm9853_vm0, %v11476_v23 }
 0x937   :  { %9604 = vmatpush3.bf16.msra.mxu0 %v10233_v17  ;;  %9622 = vmatpush3.bf16.msra.mxu1 %v10325_v54 }
 0x938   :  { %9611 = vmatprep.subr.bf16.mxu0 %v11477_v9  ;;  %9629 = vmatprep.subr.bf16.mxu1 %v11477_v9 }
 0x93a   :  { %9081 = vmatmul.mubr.msk.f32.vlgmr.msra.gmra.mrb[64].mxu0 %vm254_vm1, %v10911_v14  ;;  %9114 = vmatmul.mubr.msk.f32.vlgmr.msra.gmra.mrb[60].mxu1 %vm254_vm1, %v10927_v19 }
 0x93b   :  { %9613 = vmatpush3.bf16.msra.mxu0 %v10257_v28  ;;  %9631 = vmatpush3.bf16.msra.mxu1 %v10343_v60 }
 0x93c   :  { %9614 = vmatprep.subr.bf16.mxu0 %v11477_v9  ;;  %9632 = vmatprep.subr.bf16.mxu1 %v11477_v9 }
 0x93d   :  { %9102 = vmatprep.mubr.msk.f32.mxu0 %vm9853_vm0, %v11476_v23  ;;  %9135 = vmatprep.mubr.msk.f32.mxu1 %vm9853_vm0, %v11476_v23 }
 0x93f   :  { %9616 = vmatpush3.bf16.msra.mxu0 %v10281_v36  ;;  %9634 = vmatpush3.bf16.msra.mxu1 %v10364_v1 }
 0x940   :  { %9623 = vmatprep.subr.bf16.mxu0 %v11477_v9  ;;  %9641 = vmatprep.subr.bf16.mxu1 %v11477_v9 }
 0x942   :  { %9103 = vmatmul.mubr.msk.f32.vlgmr.msra.gmra.mrb[66].mxu0 %vm254_vm1, %v10927_v19  ;;  %9136 = vmatmul.mubr.msk.f32.vlgmr.msra.gmra.mrb[62].mxu1 %vm254_vm1, %v10911_v14 }
 0x943   :  { %9625 = vmatpush3.bf16.msra.mxu0 %v10305_v47  ;;  %9643 = vmatpush3.bf16.msra.mxu1 %v11478_v8 }
 0x944   :  { %9626 = vmatprep.subr.bf16.mxu0 %v11477_v9  ;;  %9644 = vmatprep.subr.bf16.mxu1 %v11477_v9 }
 0x945   :  { %9124 = vmatprep.mubr.msk.f32.mxu0 %vm9853_vm0, %v11476_v23  ;;  %9157 = vmatprep.mubr.msk.f32.mxu1 %vm9853_vm0, %v11476_v23 }
 0x947   :  { %9628 = vmatpush3.bf16.msra.mxu0 %v11479_v13  ;;  %9646 = vmatpush3.bf16.msra.mxu1 %v11480_v20  ;;  %v9797_v20 = vld [vmem:[%s11422_s4 + $0x3] ss:$0 sm:$0xff] }
 0x948   :  { %9635 = vmatprep.subr.bf16.mxu0 %v11477_v9  ;;  %9653 = vmatprep.subr.bf16.mxu1 %v11477_v9 }
 0x94a   :  { %9125 = vmatmul.mubr.msk.f32.vlgmr.msra.gmra.mrb[68].mxu0 %vm254_vm1, %v10927_v19  ;;  %9158 = vmatmul.mubr.msk.f32.vlgmr.msra.gmra.mrb[64].mxu1 %vm254_vm1, %v10911_v14 }
 0x94b   :  { %9637 = vmatpush3.bf16.msra.mxu0 %v11481_v26  ;;  %9655 = vmatpush3.bf16.msra.mxu1 %v11482_v31  ;;  %v9798_v31 = vld [vmem:[%s11422_s4 + $0x6] ss:$0 sm:$0xff] }
 0x94c   :  { %9638 = vmatprep.subr.bf16.mxu0 %v11477_v9  ;;  %9656 = vmatprep.subr.bf16.mxu1 %v11477_v9 }
 0x94d   :  { %9146 = vmatprep.mubr.msk.f32.mxu0 %vm9853_vm0, %v11476_v23  ;;  %9179 = vmatprep.mubr.msk.f32.mxu1 %vm9853_vm0, %v11476_v23 }
 0x94f   :  { %9640 = vmatpush3.bf16.msra.mxu0 %v11483_v32  ;;  %9658 = vmatpush3.bf16.msra.mxu1 %v11484_v37 }
 0x950   :  { %9647 = vmatprep.subr.bf16.mxu0 %v11477_v9  ;;  %9665 = vmatprep.subr.bf16.mxu1 %v11477_v9 }
 0x952   :  { %9147 = vmatmul.mubr.msk.f32.vlgmr.msra.gmra.mrb[70].mxu0 %vm254_vm1, %v10911_v14  ;;  %9180 = vmatmul.mubr.msk.f32.vlgmr.msra.gmra.mrb[66].mxu1 %vm254_vm1, %v10927_v19 }
 0x953   :  { %9649 = vmatpush3.bf16.msra.mxu0 %v11485_v38  ;;  %9667 = vmatpush3.bf16.msra.mxu1 %v11486_v44  ;;  %v9799_v44 = vld [vmem:[%s11420_s2 + $0x3] ss:$0 sm:$0xff] }
 0x954   :  { %9650 = vmatprep.subr.bf16.mxu0 %v11477_v9  ;;  %9668 = vmatprep.subr.bf16.mxu1 %v11477_v9 }
 0x955   :  { %9168 = vmatprep.mubr.msk.f32.mxu0 %vm9853_vm0, %v11476_v23  ;;  %9201 = vmatprep.mubr.msk.f32.mxu1 %vm9853_vm0, %v11476_v23 }
 0x957   :  { %9652 = vmatpush3.bf16.msra.mxu0 %v11487_v45  ;;  %9670 = vmatpush3.bf16.msra.mxu1 %v11488_v50  ;;  %v9800_v50 = vld [vmem:[%s11420_s2 + $0x6] ss:$0 sm:$0xff] }
 0x958   :  { %9659 = vmatprep.subr.bf16.mxu0 %v11477_v9  ;;  %9215 = vmatprep.subr.mxu1 %v11476_v23 }
 0x95a   :  { %9169 = vmatmul.mubr.msk.f32.vlgmr.msra.gmra.mrb[72].mxu0 %vm254_vm1, %v10911_v14  ;;  %9202 = vmatmul.mubr.msk.f32.vlgmr.msra.gmra.mrb[68].mxu1 %vm254_vm1, %v10927_v19 }
 0x95b   :  { %9661 = vmatpush3.bf16.msra.mxu0 %v11489_v51  ;;  %9190 = vmatprep.mubr.msk.f32.mxu0 %vm9853_vm0, %v11476_v23 }
 0x95c   :  { %9662 = vmatprep.subr.bf16.mxu0 %v11477_v9  ;;  %9217 = vmatprep.mubr.msk.f32.mxu1 %vm9853_vm0, %v11476_v23 }
 0x95f   :  { %9664 = vmatpush3.bf16.msra.mxu0 %v11490_v56 }
 0x960   :  { %9671 = vmatprep.subr.bf16.mxu0 %v11477_v9 }
 0x962   :  { %9191 = vmatmul.mubr.msk.f32.vlgmr.msra.gmra.mrb[74].mxu0 %vm254_vm1, %v10927_v19 }
 0x963   :  { %9673 = vmatpush3.bf16.msra.mxu0 %v11491_v57  ;;  %9212 = vmatprep.mubr.msk.f32.mxu0 %vm9853_vm0, %v11476_v23 }
 0x964   :  { %9674 = vmatprep.subr.bf16.mxu0 %v11477_v9  ;;  %v9789_v9 = vld [vmem:[%s11422_s4] ss:$0 sm:$0xff] }
 0x967   :  { %9676 = vmatpush3.bf16.msra.mxu0 %v11492_v62  ;;  %v9801_v62 = vld [vmem:[%s11422_s4 + $0x5] ss:$0 sm:$0xff] }
 0x968   :  { %9225 = vmatprep.subr.mxu0 %v11476_v23 }
 0x96a   :  { %9213 = vmatmul.mubr.msk.f32.vlgmr.msra.gmra.mrb[76].mxu0 %vm254_vm1, %v10927_v19 }
 0x96b   :  { %9227 = vmatprep.mubr.msk.f32.mxu0 %vm9853_vm0, %v11476_v23 }
 0x9dd   :  { %v4267_v63 = vpop.f32.mrb[52].mxu0  ;;  %v4407_v6 = vpop.f32.mrb[48].mxu1 }
 0x9de   :  { %v8961_v7 = vpop.f32.mrb[53].mxu0  ;;  %v8983_v16 = vpop.f32.mrb[49].mxu1  ;;  %v4268_v29 = vadd.f32 %v9790_v40, %v4267_v63  ;;  %v4408_v4 = vadd.f32 %v9792_v43, %v4407_v6  ;;  %v9802_v6 = vld [vmem:[%s11424_s6] ss:$0 sm:$0xff] }
 0x9e5   :  { %v4337_v17 = vpop.f32.mrb[54].mxu0  ;;  %v4550_v27 = vpop.f32.mrb[50].mxu1 }
 0x9e6   :  { %v8972_v28 = vpop.f32.mrb[55].mxu0  ;;  %v9005_v35 = vpop.f32.mrb[51].mxu1  ;;  %v4338_v49 = vadd.f32 %v9795_v58, %v4337_v17  ;;  %v4551_v24 = vadd.f32 %v9796_v15, %v4550_v27  ;;  %v9803_v27 = vld [vmem:[%s11420_s2 + $0x5] ss:$0 sm:$0xff] }
 0x9ed   :  { %v4477_v36 = vpop.f32.mrb[56].mxu0  ;;  %v4690_v46 = vpop.f32.mrb[52].mxu1 }
 0x9ee   :  { %v8994_v47 = vpop.f32.mrb[57].mxu0  ;;  %v9027_v54 = vpop.f32.mrb[53].mxu1  ;;  %v4478_v45 = vadd.f32 %v9799_v44, %v4477_v36  ;;  %v4691_v51 = vadd.f32 %v9800_v50, %v4690_v46  ;;  %v9804_v46 = vld [vmem:[%s11422_s4 + $0x7] ss:$0 sm:$0xff] }
 0x9f5   :  { %v11099_v60 = vpop.f32.mrb[58].mxu0  ;;  %v4830_v1 = vpop.f32.mrb[54].mxu1 }
 0x9f6   :  { %v4831_v34 = vadd.f32 %v9789_v9, %v4830_v1  ;;  %v9016_v5 = vpop.f32.mrb[59].mxu0  ;;  %v9049_v25 = vpop.f32.mrb[55].mxu1  ;;  %v4621_v28 = vadd.f32 %v9803_v27, %v11099_v60  ;;  %v9805_v60 = vld [vmem:[%s11420_s2 + $0x7] ss:$0 sm:$0xff] }
 0x9f7   :  { %v9806_v25 = vld [vmem:[%s11424_s6 + $0x1] ss:$0 sm:$0xff] }
 0x9f8   :  { %9216 = vmatpush3.xpose.msk.msra.mxu1 %vm2037_vm2, %v4831_v34 }
 0x9f9   :  { %9220 = vmatprep.subr.mxu1 %v11476_v23 }
 0x9fb   :  { %9218 = vmatmul.mubr.msk.f32.vlgmr.msra.gmra.mrb[70].mxu1 %vm2037_vm2, %v4268_v29 }
 0x9fc   :  { %9222 = vmatprep.mubr.msk.f32.mxu1 %vm9853_vm0, %v11476_v23 }
 0x9fd   :  { %v11112_v61 = vpop.f32.mrb[60].mxu0  ;;  %v4970_v2 = vpop.f32.mrb[56].mxu1 }
 0x9fe   :  { %v4971_v41 = vadd.f32 %v9791_v30, %v4970_v2  ;;  %v9038_v42 = vpop.f32.mrb[61].mxu0  ;;  %v9071_v10 = vpop.f32.mrb[57].mxu1  ;;  %v4761_v9 = vadd.f32 %v9805_v60, %v11112_v61 }
 0xa00   :  { %9226 = vmatpush3.xpose.msk.msra.mxu0 %vm2037_vm2, %v4971_v41 }
 0xa01   :  { %9235 = vmatprep.subr.mxu0 %v11476_v23 }
 0xa03   :  { %9228 = vmatmul.mubr.msk.f32.vlgmr.msra.gmra.mrb[78].mxu0 %vm2037_vm2, %v4408_v4 }
 0xa04   :  { %9237 = vmatprep.mubr.msk.f32.mxu0 %vm9853_vm0, %v11476_v23 }
 0xa05   :  { %v4900_v12 = vpop.f32.mrb[62].mxu0  ;;  %v5110_v53 = vpop.f32.mrb[58].mxu1 }
 0xa06   :  { %v4901_v52 = vadd.f32 %v9793_v59, %v4900_v12  ;;  %v5111_v48 = vadd.f32 %v9794_v0, %v5110_v53  ;;  %v9060_v22 = vpop.f32.mrb[63].mxu0  ;;  %v9093_v55 = vpop.f32.mrb[59].mxu1 }
 0xa08   :  { %9221 = vmatpush3.xpose.msk.msra.mxu1 %vm2037_vm2, %v4901_v52  ;;  %9236 = vmatpush3.xpose.msk.msra.mxu0 %vm2037_vm2, %v5111_v48 }
 0xa09   :  { %9230 = vmatprep.subr.mxu1 %v11476_v23  ;;  %9245 = vmatprep.subr.mxu0 %v11476_v23 }
 0xa0b   :  { %9223 = vmatmul.mubr.msk.f32.vlgmr.msra.gmra.mrb[72].mxu1 %vm2037_vm2, %v4338_v49  ;;  %9238 = vmatmul.mubr.msk.f32.vlgmr.msra.gmra.mrb[80].mxu0 %vm2037_vm2, %v4551_v24 }
 0xa0c   :  { %9232 = vmatprep.mubr.msk.f32.mxu1 %vm9853_vm0, %v11476_v23  ;;  %9247 = vmatprep.mubr.msk.f32.mxu0 %vm9853_vm0, %v11476_v23 }
 0xa0d   :  { %v5040_v8 = vpop.f32.mrb[64].mxu0  ;;  %v5250_v13 = vpop.f32.mrb[60].mxu1 }
 0xa0e   :  { %v5041_v26 = vadd.f32 %v9797_v20, %v5040_v8  ;;  %v5251_v32 = vadd.f32 %v9798_v31, %v5250_v13  ;;  %v9082_v37 = vpop.f32.mrb[65].mxu0  ;;  %v9115_v38 = vpop.f32.mrb[61].mxu1 }
 0xa10   :  { %9231 = vmatpush3.xpose.msk.msra.mxu1 %vm2037_vm2, %v5041_v26  ;;  %9246 = vmatpush3.xpose.msk.msra.mxu0 %vm2037_vm2, %v5251_v32 }
 0xa11   :  { %9240 = vmatprep.subr.mxu1 %v11476_v23  ;;  %9255 = vmatprep.subr.mxu0 %v11476_v23 }
 0xa13   :  { %9233 = vmatmul.mubr.msk.f32.vlgmr.msra.gmra.mrb[74].mxu1 %vm2037_vm2, %v4478_v45  ;;  %9248 = vmatmul.mubr.msk.f32.vlgmr.msra.gmra.mrb[82].mxu0 %vm2037_vm2, %v4691_v51 }
 0xa14   :  { %9242 = vmatprep.mubr.msk.f32.mxu1 %vm9853_vm0, %v11476_v23  ;;  %9257 = vmatprep.mubr.msk.f32.mxu0 %vm9853_vm0, %v11476_v23 }
 0xa15   :  { %v5180_v56 = vpop.f32.mrb[66].mxu0  ;;  %v5390_v57 = vpop.f32.mrb[62].mxu1 }
 0xa16   :  { %v5181_v63 = vadd.f32 %v9801_v62, %v5180_v56  ;;  %v5391_v7 = vadd.f32 %v9802_v6, %v5390_v57  ;;  %v9104_v16 = vpop.f32.mrb[67].mxu0  ;;  %v9137_v17 = vpop.f32.mrb[63].mxu1 }
 0xa18   :  { %9241 = vmatpush3.xpose.msk.msra.mxu1 %vm2037_vm2, %v5181_v63  ;;  %9256 = vmatpush3.msra.mxu0 %v5391_v7 }
 0xa19   :  { %9250 = vmatprep.subr.mxu1 %v11476_v23  ;;  %9265 = vmatprep.subr.mxu0 %v11476_v23 }
 0xa1b   :  { %9243 = vmatmul.mubr.msk.f32.vlgmr.msra.gmra.mrb[76].mxu1 %vm2037_vm2, %v4621_v28 }
 0xa1c   :  { %9252 = vmatprep.mubr.msk.f32.mxu1 %vm9853_vm0, %v11476_v23 }
 0xa1d   :  { %v5320_v35 = vpop.f32.mrb[68].mxu0  ;;  %v11185_v36 = vpop.f32.mrb[64].mxu1 }
 0xa1e   :  { %v5321_v47 = vadd.f32 %v9804_v46, %v5320_v35  ;;  %v9126_v54 = vpop.f32.mrb[69].mxu0  ;;  %v9159_v1 = vpop.f32.mrb[65].mxu1 }
 0xa20   :  { %9251 = vmatpush3.xpose.msk.msra.mxu1 %vm2037_vm2, %v5321_v47 }
 0xa21   :  { %9260 = vmatprep.subr.mxu1 %v11476_v23 }
 0xa23   :  { %9253 = vmatmul.mubr.msk.f32.vlgmr.msra.gmra.mrb[78].mxu1 %vm2037_vm2, %v4761_v9 }
 0xa24   :  { %9262 = vmatprep.mubr.msk.f32.mxu1 %vm9853_vm0, %v11476_v23 }
 0xa25   :  { %v5460_v34 = vpop.f32.mrb[70].mxu0  ;;  %v11199_v5 = vpop.f32.mrb[66].mxu1 }
 0xa26   :  { %v5461_v40 = vadd.f32 %v9806_v25, %v5460_v34  ;;  %v9148_v29 = vpop.f32.mrb[71].mxu0  ;;  %v9181_v2 = vpop.f32.mrb[67].mxu1 }
 0xa28   :  { %9261 = vmatpush3.msra.mxu1 %v5461_v40 }
 0xa29   :  { %9270 = vmatprep.subr.mxu1 %v11476_v23 }
 0xa2d   :  { %v11205_v61 = vpop.f32.mrb[72].mxu0  ;;  %v11207_v30 = vpop.f32.mrb[68].mxu1 }
 0xa2e   :  { %v9170_v41 = vpop.f32.mrb[73].mxu0  ;;  %v9203_v42 = vpop.f32.mrb[69].mxu1 }
 0xa35   :  { %v11209_v10 = vpop.f32.mrb[74].mxu0 }
 0xa36   :  { %v9192_v43 = vpop.f32.mrb[75].mxu0 }
 0xa3d   :  { %v11211_v4 = vpop.f32.mrb[76].mxu0 }
 0xa3e   :  { %v9214_v12 = vpop.f32.mrb[77].mxu0 }
 0xace   :  { %v5956_v53 = vpop.f32.mrb[70].mxu1 }
 0xacf   :  { %v6492_v59 = vmul.f32 0.35355338, %v5956_v53  ;;  %v9219_v52 = vpop.f32.mrb[71].mxu1 }
 0xad1   :  { %v6500_v0 = vsel %vm2037_vm2, %v6492_v59, -inf }
 0xad2   :  { %6501 = vmax.xlane.f32.xlu0 %v6500_v0 }
 0xad6   :  { %v6108_v48 = vpop.f32.mrb[78].mxu0 }
 0xad7   :  { %v6494_v22 = vmul.f32 0.35355338, %v6108_v48  ;;  %v9229_v55 = vpop.f32.mrb[79].mxu0 }
 0xad9   :  { %v6506_v58 = vsel %vm2037_vm2, %v6494_v22, -inf }
 0xada   :  { %6507 = vmax.xlane.f32.xlu0 %v6506_v58 }
 0xade   :  { %v6032_v49 = vpop.f32.mrb[72].mxu1  ;;  %v6260_v15 = vpop.f32.mrb[80].mxu0 }
 0xadf   :  { %v6493_v24 = vmul.f32 0.35355338, %v6032_v49  ;;  %v6496_v8 = vmul.f32 0.35355338, %v6260_v15  ;;  %v9224_v13 = vpop.f32.mrb[73].mxu1  ;;  %v9239_v20 = vpop.f32.mrb[81].mxu0 }
 0xae1   :  { %v6503_v26 = vsel %vm2037_vm2, %v6493_v24, -inf  ;;  %v6512_v31 = vsel %vm2037_vm2, %v6496_v8, -inf }
 0xae2   :  { %6504 = vmax.xlane.f32.xlu1 %v6503_v26  ;;  %6513 = vmax.xlane.f32.xlu0 %v6512_v31 }
 0xae6   :  { %v6184_v32 = vpop.f32.mrb[74].mxu1  ;;  %v6412_v37 = vpop.f32.mrb[82].mxu0 }
 0xae7   :  { %v6495_v38 = vmul.f32 0.35355338, %v6184_v32  ;;  %v6498_v44 = vmul.f32 0.35355338, %v6412_v37  ;;  %v9234_v45 = vpop.f32.mrb[75].mxu1  ;;  %v9249_v50 = vpop.f32.mrb[83].mxu0 }
 0xae9   :  { %v6509_v51 = vsel %vm2037_vm2, %v6495_v38, -inf  ;;  %v6518_v56 = vsel %vm2037_vm2, %v6498_v44, -inf }
 0xaea   :  { %6510 = vmax.xlane.f32.xlu1 %v6509_v51  ;;  %6519 = vmax.xlane.f32.xlu0 %v6518_v56 }
 0xaee   :  { %v6336_v57 = vpop.f32.mrb[76].mxu1 }
 0xaef   :  { %v6497_v62 = vmul.f32 0.35355338, %v6336_v57  ;;  %v9244_v63 = vpop.f32.mrb[77].mxu1 }
 0xaf1   :  { %v6515_v6 = vsel %vm2037_vm2, %v6497_v62, -inf }
 0xaf2   :  { %6516 = vmax.xlane.f32.xlu1 %v6515_v6  ;;  %v9807_v6 = vld [vmem:[%s11424_s6 + $0x2] ss:$0 sm:$0xff] }
 0xaf6   :  { %v6488_v7 = vpop.f32.mrb[78].mxu1 }
 0xaf7   :  { %v6499_v16 = vmul.f32 0.35355338, %v6488_v7  ;;  %v9254_v17 = vpop.f32.mrb[79].mxu1  ;;  %v5531_v7 = vadd.f32 %v9807_v6, %v11185_v36 }
 0xaf9   :  { %v6521_v27 = vsel %vm2037_vm2, %v6499_v16, -inf }
 0xafa   :  { %6522 = vmax.xlane.f32.xlu1 %v6521_v27 }
 0xb5f   :  { %v6502_v28 = vpop.xlane.xlu0 %6501 }
 0xb60   :  { %v6524_v35 = vsub.f32 %v6492_v59, %v6502_v28 }
 0xb62   :  { %v6532_v46 = vmul.f32 1.442695, %v6524_v35  ;;  %v9808_v35 = vld [vmem:[%s11424_s6 + $0x4] ss:$0 sm:$0xff] }
 0xb63   :  { %v5671_v36 = vadd.f32 %v9808_v35, %v11199_v5 }
 0xb64   :  { %9747 = vpow2.f32 %v6532_v46 }
 0xb67   :  { %v6508_v47 = vpop.xlane.xlu0 %6507 }
 0xb68   :  { %v6526_v54 = vsub.f32 %v6494_v22, %v6508_v47 }
 0xb6a   :  { %v6536_v1 = vmul.f32 1.442695, %v6526_v54 }
 0xb6c   :  { %9749 = vpow2.f32 %v6536_v1 }
 0xb6e   :  { %v9748_v60 = vpop.eup %9747 }
 0xb6f   :  { %v6505_v9 = vpop.xlane.xlu1 %6504  ;;  %v6514_v34 = vpop.xlane.xlu0 %6513  ;;  %v6548_v25 = vsel %vm2037_vm2, %v9748_v60, 0.0 }
 0xb70   :  { %v6525_v40 = vsub.f32 %v6493_v24, %v6505_v9  ;;  %v6528_v29 = vsub.f32 %v6496_v8, %v6514_v34  ;;  %6549 = vadd.xlane.f32.xlu0 %v6548_v25  ;;  %v9809_v9 = vld [vmem:[%s11424_s6 + $0x3] ss:$0 sm:$0xff]  ;;  %v9810_v25 = vld [vmem:[%s11424_s6 + $0x6] ss:$0 sm:$0xff] }
 0xb71   :  { %v5601_v5 = vadd.f32 %v9809_v9, %v11205_v61  ;;  %v9821_v9 = vld [vmem:[%s11426_s8] ss:$0 sm:$0xff] }
 0xb72   :  { %v6534_v2 = vmul.f32 1.442695, %v6525_v40  ;;  %v6540_v41 = vmul.f32 1.442695, %v6528_v29  ;;  %v5811_v40 = vadd.f32 %v9810_v25, %v11207_v30 }
 0xb74   :  { %9751 = vpow2.f32 %v6534_v2 }
 0xb75   :  { %9753 = vpow2.f32 %v6540_v41  ;;  %v9811_v41 = vld [vmem:[%s11424_s6 + $0x5] ss:$0 sm:$0xff] }
 0xb76   :  { %v9750_v42 = vpop.eup %9749 }
 0xb77   :  { %v6511_v43 = vpop.xlane.xlu1 %6510  ;;  %v6520_v12 = vpop.xlane.xlu0 %6519  ;;  %v6554_v53 = vsel %vm2037_vm2, %v9750_v42, 0.0 }
 0xb78   :  { %v6527_v59 = vsub.f32 %v6495_v38, %v6511_v43  ;;  %v6530_v52 = vsub.f32 %v6498_v44, %v6520_v12  ;;  %6555 = vadd.xlane.f32.xlu0 %v6554_v53  ;;  %v9812_v53 = vld [vmem:[%s11425_s7] sm:$0xff] }
 0xb7a   :  { %v6538_v0 = vmul.f32 1.442695, %v6527_v59  ;;  %v6544_v48 = vmul.f32 1.442695, %v6530_v52  ;;  %v9813_v52 = vld [vmem:[%s11424_s6 + $0x7] ss:$0 sm:$0xff] }
 0xb7b   :  { %s9828_s6 = scalar_lea.vmem %s8008_s20, 256 }
 0xb7c   :  { %9755 = vpow2.f32 %v6538_v0  ;;  %v5881_v0 = vadd.f32 %v9813_v52, %v11211_v4  ;;  %p9829_p0 = scmp.ne.s32.totalorder %s8008_s20, %s9828_s6  ;;  %p9834_p2 = scmp.lt.s32.totalorder %s9828_s6, %s9828_s6 }
 0xb7d   :  { %9757 = vpow2.f32 %v6544_v48 }
 0xb7e   :  { %v9752_v22 = vpop.eup %9751  ;;  %p9835_p3 = por %p9834_p2, %p9833_p1 }
 0xb7f   :  { %v9754_v55 = vpop.eup %9753  ;;  %v6517_v58 = vpop.xlane.xlu1 %6516  ;;  %v6551_v49 = vsel %vm2037_vm2, %v9752_v22, 0.0 }
 0xb80   :  { %v6529_v15 = vsub.f32 %v6497_v62, %v6517_v58  ;;  %6552 = vadd.xlane.f32.xlu1 %v6551_v49  ;;  %v6560_v24 = vsel %vm2037_vm2, %v9754_v55, 0.0  ;;  %v9815_v49 = vld [vmem:[%s11425_s7 + $0x10] sm:$0xff]  ;;  %p9836_p4 = pnand %p9835_p3, %p9829_p0 }
 0xb81   :  { %6561 = vadd.xlane.f32.xlu0 %v6560_v24 }
 0xb82   :  { %v6542_v8 = vmul.f32 1.442695, %v6529_v15 }
 0xb84   :  { %9759 = vpow2.f32 %v6542_v8  ;;  %v9816_v8 = vld [vmem:[%s11425_s7 + $0x20] sm:$0xff] }
 0xb86   :  { %v11225_v13 = vpop.eup %9755 }
 0xb87   :  { %v11227_v20 = vpop.eup %9757  ;;  %v6523_v26 = vpop.xlane.xlu1 %6522  ;;  %v6557_v31 = vsel %vm2037_vm2, %v11225_v13, 0.0 }
 0xb88   :  { %v6531_v32 = vsub.f32 %v6499_v16, %v6523_v26  ;;  %6558 = vadd.xlane.f32.xlu1 %v6557_v31  ;;  %v6566_v37 = vsel %vm2037_vm2, %v11227_v20, 0.0 }
 0xb89   :  { %6567 = vadd.xlane.f32.xlu0 %v6566_v37  ;;  %v9818_v37 = vld [vmem:[%s11425_s7 + $0x30] sm:$0xff] }
 0xb8a   :  { %v6546_v38 = vmul.f32 1.442695, %v6531_v32  ;;  %v9817_v32 = vld [vmem:[%s11425_s7 + $0x18] sm:$0xff] }
 0xb8c   :  { %9761 = vpow2.f32 %v6546_v38 }
 0xb8e   :  { %v11233_v44 = vpop.eup %9759 }
 0xb8f   :  { %v6563_v45 = vsel %vm2037_vm2, %v11233_v44, 0.0 }
 0xb90   :  { %6564 = vadd.xlane.f32.xlu1 %v6563_v45 }
 0xb96   :  { %v11237_v50 = vpop.eup %9761 }
 0xb97   :  { %v6569_v51 = vsel %vm2037_vm2, %v11237_v50, 0.0 }
 0xb98   :  { %6570 = vadd.xlane.f32.xlu1 %v6569_v51  ;;  %v9819_v51 = vld [vmem:[%s11425_s7 + $0x28] sm:$0xff] }
 0xbfd   :  { %v6550_v56 = vpop.xlane.xlu0 %6549 }
 0xbfe   :  { %9763 = vrcp.f32 %v6550_v56 }
 0xc05   :  { %v6556_v57 = vpop.xlane.xlu0 %6555 }
 0xc06   :  { %9765 = vrcp.f32 %v6556_v57 }
 0xc08   :  { %v9764_v62 = vpop.eup %9763 }
 0xc09   :  { %v6580_v63 = vmul.f32 %v9764_v62, %v9748_v60  ;;  %v9820_v62 = vld [vmem:[%s11425_s7 + $0x38] sm:$0xff] }
 0xc0b   :  { %9258 = vmatmul.mubr.msk.f32.vlgmr.msra.gmra.mrb[84].mxu0 %vm2037_vm2, %v6580_v63 }
 0xc0c   :  { %9266 = vmatpush3.msra.mxu0 %v5531_v7  ;;  %9267 = vmatprep.mubr.msk.f32.mxu0 %vm9853_vm0, %v11476_v23 }
 0xc0d   :  { %v6553_v16 = vpop.xlane.xlu1 %6552  ;;  %9275 = vmatprep.subr.mxu0 %v11476_v23 }
 0xc0e   :  { %9767 = vrcp.f32 %v6553_v16  ;;  %v6562_v17 = vpop.xlane.xlu0 %6561 }
 0xc0f   :  { %9769 = vrcp.f32 %v6562_v17 }
 0xc10   :  { %v9766_v27 = vpop.eup %9765 }
 0xc11   :  { %v6582_v28 = vmul.f32 %v9766_v27, %v9750_v42  ;;  %v5741_v42 = vadd.f32 %v9811_v41, %v11209_v10 }
 0xc13   :  { %9268 = vmatmul.mubr.msk.f32.vlgmr.msra.gmra.mrb[86].mxu0 %vm2037_vm2, %v6582_v28 }
 0xc14   :  { %9276 = vmatpush3.msra.mxu0 %v5671_v36  ;;  %9277 = vmatprep.mubr.msk.f32.mxu0 %vm9853_vm0, %v11476_v23 }
 0xc15   :  { %v6559_v46 = vpop.xlane.xlu1 %6558  ;;  %9285 = vmatprep.subr.mxu0 %v11476_v23 }
 0xc16   :  { %9771 = vrcp.f32 %v6559_v46  ;;  %v6568_v47 = vpop.xlane.xlu0 %6567 }
 0xc17   :  { %9773 = vrcp.f32 %v6568_v47 }
 0xc18   :  { %v9768_v54 = vpop.eup %9767 }
 0xc19   :  { %v9770_v1 = vpop.eup %9769  ;;  %v6581_v60 = vmul.f32 %v9768_v54, %v9752_v22 }
 0xc1a   :  { %v6584_v34 = vmul.f32 %v9770_v1, %v9754_v55  ;;  %v9814_v55 = vld [vmem:[%s11425_s7 + $0x8] sm:$0xff] }
 0xc1b   :  { %9263 = vmatmul.mubr.msk.f32.vlgmr.msra.gmra.mrb[80].mxu1 %vm2037_vm2, %v6581_v60 }
 0xc1c   :  { %9271 = vmatpush3.msra.mxu1 %v5601_v5  ;;  %9278 = vmatmul.mubr.msk.f32.vlgmr.msra.gmra.mrb[88].mxu0 %vm2037_vm2, %v6584_v34 }
 0xc1d   :  { %9286 = vmatpush3.msra.mxu0 %v5811_v40  ;;  %v6565_v29 = vpop.xlane.xlu1 %6564  ;;  %9272 = vmatprep.mubr.msk.f32.mxu1 %vm9853_vm0, %v11476_v23 }
 0xc1e   :  { %9775 = vrcp.f32 %v6565_v29  ;;  %9280 = vmatprep.subr.mxu1 %v11476_v23  ;;  %9287 = vmatprep.mubr.msk.f32.mxu0 %vm9853_vm0, %v11476_v23 }
 0xc1f   :  { %9295 = vmatprep.subr.mxu0 %v11476_v23 }
 0xc20   :  { %v9772_v61 = vpop.eup %9771 }
 0xc21   :  { %v9774_v30 = vpop.eup %9773  ;;  %v6583_v2 = vmul.f32 %v9772_v61, %v11225_v13 }
 0xc22   :  { %v6586_v43 = vmul.f32 %v9774_v30, %v11227_v20 }
 0xc23   :  { %9273 = vmatmul.mubr.msk.f32.vlgmr.msra.gmra.mrb[82].mxu1 %vm2037_vm2, %v6583_v2 }
 0xc24   :  { %9281 = vmatpush3.msra.mxu1 %v5741_v42  ;;  %9288 = vmatmul.mubr.msk.f32.vlgmr.msra.gmra.mrb[90].mxu0 %vm2037_vm2, %v6586_v43 }
 0xc25   :  { %v6571_v12 = vpop.xlane.xlu1 %6570  ;;  %9282 = vmatprep.mubr.msk.f32.mxu1 %vm9853_vm0, %v11476_v23  ;;  %9290 = vmatprep.subr.mxu1 %v11476_v23 }
 0xc26   :  { %9777 = vrcp.f32 %v6571_v12  ;;  %9296 = vmatpush3.msra.mxu0 %v9812_v53  ;;  %9297 = vmatprep.mubr.msk.f32.mxu0 %vm9853_vm0, %v11476_v23 }
 0xc27   :  { %9305 = vmatprep.subr.mxu0 %v11476_v23 }
 0xc28   :  { %v9776_v10 = vpop.eup %9775 }
 0xc29   :  { %v6585_v59 = vmul.f32 %v9776_v10, %v11233_v44 }
 0xc2b   :  { %9283 = vmatmul.mubr.msk.f32.vlgmr.msra.gmra.mrb[84].mxu1 %vm2037_vm2, %v6585_v59 }
 0xc2c   :  { %9291 = vmatpush3.msra.mxu1 %v5881_v0  ;;  %9292 = vmatprep.mubr.msk.f32.mxu1 %vm9853_vm0, %v11476_v23 }
 0xc2d   :  { %9300 = vmatprep.subr.mxu1 %v11476_v23 }
 0xc30   :  { %v9778_v48 = vpop.eup %9777 }
 0xc31   :  { %v6587_v22 = vmul.f32 %v9778_v48, %v11237_v50 }
 0xc33   :  { %9293 = vmatmul.mubr.msk.f32.vlgmr.msra.gmra.mrb[86].mxu1 %vm2037_vm2, %v6587_v22 }
 0xc34   :  { %9301 = vmatpush3.msra.mxu1 %v9814_v55  ;;  %9302 = vmatprep.mubr.msk.f32.mxu1 %vm9853_vm0, %v11476_v23 }
 0xc35   :  { %9310 = vmatprep.subr.mxu1 %v11476_v23 }
 0xcde   :  { %v6657_v4 = vpop.f32.mrb[84].mxu0 }
 0xcdf   :  { %v9259_v58 = vpop.f32.mrb[85].mxu0  ;;  %9298 = vmatmul.mubr.msk.f32.vlgmr.msra.gmra.mrb[92].mxu0 %vm2037_vm2, %v6657_v4 }
 0xce0   :  { %9306 = vmatpush3.msra.mxu0 %v9815_v49  ;;  %9307 = vmatprep.mubr.msk.f32.mxu0 %vm9853_vm0, %v11476_v23 }
 0xce1   :  { %9315 = vmatprep.subr.mxu0 %v11476_v23 }
 0xce6   :  { %v6803_v15 = vpop.f32.mrb[86].mxu0 }
 0xce7   :  { %v9269_v24 = vpop.f32.mrb[87].mxu0  ;;  %9308 = vmatmul.mubr.msk.f32.vlgmr.msra.gmra.mrb[94].mxu0 %vm2037_vm2, %v6803_v15 }
 0xce8   :  { %9316 = vmatpush3.msra.mxu0 %v9816_v8  ;;  %9317 = vmatprep.mubr.msk.f32.mxu0 %vm9853_vm0, %v11476_v23 }
 0xce9   :  { %9325 = vmatprep.subr.mxu0 %v11476_v23 }
 0xcee   :  { %v6730_v13 = vpop.f32.mrb[80].mxu1 }
 0xcef   :  { %v6949_v20 = vpop.f32.mrb[88].mxu0  ;;  %v9264_v26 = vpop.f32.mrb[81].mxu1  ;;  %9303 = vmatmul.mubr.msk.f32.vlgmr.msra.gmra.mrb[88].mxu1 %vm2037_vm2, %v6730_v13 }
 0xcf0   :  { %v9279_v31 = vpop.f32.mrb[89].mxu0  ;;  %9318 = vmatmul.mubr.msk.f32.vlgmr.msra.gmra.mrb[96].mxu0 %vm2037_vm2, %v6949_v20  ;;  %9311 = vmatpush3.msra.mxu1 %v9817_v32 }
 0xcf1   :  { %9312 = vmatprep.mubr.msk.f32.mxu1 %vm9853_vm0, %v11476_v23  ;;  %9326 = vmatpush3.msra.mxu0 %v9818_v37 }
 0xcf2   :  { %9327 = vmatprep.mubr.msk.f32.mxu0 %vm9853_vm0, %v11476_v23  ;;  %9320 = vmatprep.subr.mxu1 %v11476_v23 }
 0xcf3   :  { %9678 = vmatprep.subr.bf16.mxu0 %v10817_v18 }
 0xcf6   :  { %v6876_v38 = vpop.f32.mrb[82].mxu1 }
 0xcf7   :  { %v7095_v44 = vpop.f32.mrb[90].mxu0  ;;  %v9274_v45 = vpop.f32.mrb[83].mxu1  ;;  %9313 = vmatmul.mubr.msk.f32.vlgmr.msra.gmra.mrb[90].mxu1 %vm2037_vm2, %v6876_v38  ;;  %v9822_v38 = vld [vmem:[%s11431_s13] ss:$0 sm:$0xff] }
 0xcf8   :  { %v9289_v50 = vpop.f32.mrb[91].mxu0  ;;  %9328 = vmatmul.mubr.msk.f32.vlgmr.msra.gmra.mrb[98].mxu0 %vm2037_vm2, %v7095_v44  ;;  %9321 = vmatpush3.msra.mxu1 %v9819_v51 }
 0xcf9   :  { %9322 = vmatprep.mubr.msk.f32.mxu1 %vm9853_vm0, %v11476_v23  ;;  %9330 = vmatprep.subr.mxu1 %v11476_v23  ;;  %v9823_v50 = vld [vmem:[%s11432_s14] ss:$0 sm:$0xff] }
 0xcfa   :  { %9680 = vmatpush3.bf16.msra.mxu0 %v10817_v18 }
 0xcfb   :  { %9682 = vmatprep.subr.bf16.mxu0 %v10827_v39 }
 0xcfe   :  { %v7022_v56 = vpop.f32.mrb[84].mxu1  ;;  %9684 = vmatpush3.bf16.msra.mxu0 %v10827_v39 }
 0xcff   :  { %v9284_v57 = vpop.f32.mrb[85].mxu1  ;;  %9323 = vmatmul.mubr.msk.f32.vlgmr.msra.gmra.mrb[92].mxu1 %vm2037_vm2, %v7022_v56 }
 0xd00   :  { %9331 = vmatpush3.msra.mxu1 %v9820_v62  ;;  %9332 = vmatprep.mubr.msk.f32.mxu1 %vm9853_vm0, %v11476_v23 }
 0xd01   :  { %9686 = vmatprep.subr.bf16.mxu1 %v10841_v33 }
 0xd06   :  { %v7168_v63 = vpop.f32.mrb[86].mxu1 }
 0xd07   :  { %v9294_v18 = vpop.f32.mrb[87].mxu1  ;;  %9333 = vmatmul.mubr.msk.f32.vlgmr.msra.gmra.mrb[94].mxu1 %vm2037_vm2, %v7168_v63 }
 0xd08   :  { %9688 = vmatpush3.bf16.msra.mxu1 %v10841_v33 }
 0xd09   :  { %9690 = vmatprep.subr.bf16.mxu1 %v10846_v3 }
 0xd0c   :  { %9692 = vmatpush3.bf16.msra.mxu1 %v10846_v3 }
 0xd0d   :  { %9694 = vmatprep.subr.bf16.mxu1 %v10857_v11 }
 0xd10   :  { %9696 = vmatpush3.bf16.msra.mxu1 %v10857_v11 }
 0xd11   :  { %9698 = vmatprep.subr.bf16.mxu1 %v10882_v21 }
 0xd14   :  { %9700 = vmatpush3.bf16.msra.mxu1 %v10882_v21 }
 0xdb2   :  { %v7241_v23 = vpop.f32.mrb[92].mxu0 }
 0xdb3   :  { %v9299_v39 = vpop.f32.mrb[93].mxu0  ;;  %v7756_v17 = vsel %vm254_vm1, %v7241_v23, 0.0  ;;  %v9824_v23 = vld [vmem:[%s11428_s10] ss:$0 sm:$0xff] }
 0xdba   :  { %v7387_v6 = vpop.f32.mrb[94].mxu0 }
 0xdbb   :  { %v9309_v7 = vpop.f32.mrb[95].mxu0  ;;  %v7759_v36 = vsel %vm254_vm1, %v7387_v6, 0.0 }
 0xdc2   :  { %v7314_v16 = vpop.f32.mrb[88].mxu1 }
 0xdc3   :  { %v7757_v33 = vsel %vm254_vm1, %v7314_v16, 0.0  ;;  %v7533_v27 = vpop.f32.mrb[96].mxu0  ;;  %v9304_v28 = vpop.f32.mrb[89].mxu1 }
 0xdc4   :  { %v7758_v3 = vadd.f32 %v7757_v33, %v7756_v17  ;;  %v9319_v35 = vpop.f32.mrb[97].mxu0  ;;  %v7763_v29 = vsel %vm254_vm1, %v7533_v27, 0.0  ;;  %v9825_v27 = vld [vmem:[%s11430_s12] ss:$0 sm:$0xff] }
 0xdc6   :  { %v7760_v11 = vadd.f32 %v7759_v36, %v7758_v3 }
 0xdca   :  { %v7460_v46 = vpop.f32.mrb[90].mxu1 }
 0xdcb   :  { %v7761_v47 = vsel %vm254_vm1, %v7460_v46, 0.0  ;;  %v7679_v21 = vpop.f32.mrb[98].mxu0  ;;  %v9314_v54 = vpop.f32.mrb[91].mxu1 }
 0xdcc   :  { %v7762_v1 = vadd.f32 %v7761_v47, %v7760_v11  ;;  %v9329_v60 = vpop.f32.mrb[99].mxu0  ;;  %v7766_v41 = vsel %vm254_vm1, %v7679_v21, 0.0 }
 0xdce   :  { %v7770_v5 = vadd.f32 %v9821_v9, %v7762_v1 }
 0xdd0   :  { %v7772_v34 = vadd.f32 %v7770_v5, %v10911_v14 }
 0xdd2   :  { %v7606_v25 = vpop.f32.mrb[92].mxu1  ;;  %v7774_v40 = vsel %vm254_vm1, %v7772_v34, 0.0 }
 0xdd3   :  { %v7764_v61 = vsel %vm254_vm1, %v7606_v25, 0.0  ;;  %v9324_v30 = vpop.f32.mrb[93].mxu1  ;;  %7775 = vadd.xlane.f32.xlu0 %v7774_v40 }
 0xdd4   :  { %v7765_v2 = vadd.f32 %v7764_v61, %v7763_v29 }
 0xdd6   :  { %v7767_v42 = vadd.f32 %v7766_v41, %v7765_v2 }
 0xdda   :  { %v7752_v43 = vpop.f32.mrb[94].mxu1 }
 0xddb   :  { %v7768_v12 = vsel %vm254_vm1, %v7752_v43, 0.0  ;;  %v9334_v53 = vpop.f32.mrb[95].mxu1 }
 0xddc   :  { %v7769_v10 = vadd.f32 %v7768_v12, %v7767_v42 }
 0xdde   :  { %v7771_v59 = vadd.f32 %v9821_v9, %v7769_v10 }
 0xde0   :  { %v7773_v14 = vadd.f32 %v7771_v59, %v10927_v19 }
 0xde2   :  { %v7777_v52 = vsel %vm254_vm1, %v7773_v14, 0.0 }
 0xde3   :  { %7778 = vadd.xlane.f32.xlu1 %v7777_v52 }
 0xe60   :  { %v7776_v0 = vpop.xlane.xlu0 %7775 }
 0xe61   :  { %v7780_v48 = vmul.f32 0.03125, %v7776_v0 }
 0xe63   :  { %v7782_v22 = vsub.f32 %v7772_v34, %v7780_v48  ;;  %v9827_v48 = vld [vmem:[%s11434_s16] ss:$0 sm:$0xff] }
 0xe65   :  { %v7784_v55 = vmul.f32 %v7782_v22, %v7782_v22 }
 0xe67   :  { %v7786_v4 = vsel %vm254_vm1, %v7784_v55, 0.0 }
 0xe68   :  { %7787 = vadd.xlane.f32.xlu0 %v7786_v4 }
 0xe70   :  { %v7779_v58 = vpop.xlane.xlu1 %7778 }
 0xe71   :  { %v7781_v49 = vmul.f32 0.03125, %v7779_v58 }
 0xe73   :  { %v7783_v15 = vsub.f32 %v7773_v14, %v7781_v49  ;;  %v9826_v14 = vld [vmem:[%s11433_s15] ss:$0 sm:$0xff] }
 0xe75   :  { %v7785_v24 = vmul.f32 %v7783_v15, %v7783_v15 }
 0xe77   :  { %v7789_v8 = vsel %vm254_vm1, %v7785_v24, 0.0 }
 0xe78   :  { %7790 = vadd.xlane.f32.xlu1 %v7789_v8 }
 0xef5   :  { %v7788_v13 = vpop.xlane.xlu0 %7787 }
 0xef6   :  { %v7792_v20 = vmul.f32 0.03125, %v7788_v13 }
 0xef8   :  { %v7794_v19 = vadd.f32 1e-05, %v7792_v20 }
 0xefa   :  { %9779 = vrsqrt.f32 %v7794_v19 }
 0xf04   :  { %v9780_v26 = vpop.eup %9779 }
 0xf05   :  { %v7791_v31 = vpop.xlane.xlu1 %7790  ;;  %v7798_v32 = vmul.f32 %v9780_v26, %v7782_v22 }
 0xf06   :  { %v7793_v37 = vmul.f32 0.03125, %v7791_v31 }
 0xf07   :  { %v7800_v44 = vmul.f32 %v9822_v38, %v7798_v32 }
 0xf08   :  { %v7795_v45 = vadd.f32 1e-05, %v7793_v37 }
 0xf09   :  { %v7802_v51 = vadd.f32 %v9823_v50, %v7800_v44 }
 0xf0a   :  { %9781 = vrsqrt.f32 %v7795_v45 }
 0xf0b   :  { %9343 = vmatprep.mubr.msk.f32.mxu0 %vm254_vm1, %v7802_v51 }
 0xf14   :  { %v9782_v56 = vpop.eup %9781 }
 0xf15   :  { %v7799_v57 = vmul.f32 %v9782_v56, %v7783_v15 }
 0xf17   :  { %v7801_v62 = vmul.f32 %v9822_v38, %v7799_v57 }
 0xf19   :  { %v7803_v63 = vadd.f32 %v9823_v50, %v7801_v62 }
 0xf1b   :  { %9344 = vmatmul.mubr.msk.f32.vlgmr.msra.gmra.mrb[100].mxu0 %vm254_vm1, %v7803_v63 }
 0xfee   :  { %v9345_v18 = vpop.f32.mrb[100].mxu0 }
 0xfef   :  { %v7882_v39 = vadd.f32 %v9824_v23, %v9345_v18  ;;  %v7876_v6 = vpop.f32.mrb[101].mxu0 }
 0xff0   :  { %v7877_v7 = vadd.f32 %v9824_v23, %v7876_v6 }
 0xff1   :  { %v7886_v17 = vmax.f32 %v7882_v39, 0.0 }
 0xff2   :  { %v7885_v16 = vmax.f32 %v7877_v7, 0.0 }
 0xff4   :  { %9362 = vmatprep.mubr.msk.f32.mxu1 %vm4072_vm3, %v7885_v16 }
 0xff5   :  { %9363 = vmatmul.mubr.msk.f32.vlgmr.msra.gmra.mrb[96].mxu1 %vm4072_vm3, %v7886_v17 }
0x10c8   :  { %v9364_v33 = vpop.f32.mrb[96].mxu1 }
0x10c9   :  { %v7965_v28 = vadd.f32 %v9825_v27, %v9364_v33  ;;  %v7959_v3 = vpop.f32.mrb[97].mxu1 }
0x10ca   :  { %v7960_v35 = vadd.f32 %v9825_v27, %v7959_v3 }
0x10cb   :  { %v7969_v36 = vadd.f32 %v7965_v28, %v7803_v63 }
0x10cc   :  { %v7968_v11 = vadd.f32 %v7960_v35, %v7802_v51 }
0x10cd   :  { %v7973_v46 = vsel %vm254_vm1, %v7969_v36, 0.0 }
0x10ce   :  { %7974 = vadd.xlane.f32.xlu1 %v7973_v46  ;;  %v7970_v47 = vsel %vm254_vm1, %v7968_v11, 0.0 }
0x10cf   :  { %7971 = vadd.xlane.f32.xlu0 %v7970_v47 }
0x115b   :  { %v7975_v21 = vpop.xlane.xlu1 %7974 }
0x115c   :  { %v7977_v54 = vmul.f32 0.03125, %v7975_v21  ;;  %v7972_v1 = vpop.xlane.xlu0 %7971 }
0x115d   :  { %v7976_v60 = vmul.f32 0.03125, %v7972_v1 }
0x115e   :  { %v7979_v9 = vsub.f32 %v7969_v36, %v7977_v54 }
0x115f   :  { %v7978_v5 = vsub.f32 %v7968_v11, %v7976_v60 }
0x1160   :  { %v7981_v34 = vmul.f32 %v7979_v9, %v7979_v9 }
0x1161   :  { %v7980_v25 = vmul.f32 %v7978_v5, %v7978_v5 }
0x1162   :  { %v7985_v40 = vsel %vm254_vm1, %v7981_v34, 0.0 }
0x1163   :  { %7986 = vadd.xlane.f32.xlu1 %v7985_v40  ;;  %v7982_v29 = vsel %vm254_vm1, %v7980_v25, 0.0 }
0x1164   :  { %7983 = vadd.xlane.f32.xlu0 %v7982_v29 }
0x11f0   :  { %v7987_v61 = vpop.xlane.xlu1 %7986 }
0x11f1   :  { %v7989_v30 = vmul.f32 0.03125, %v7987_v61  ;;  %v7984_v2 = vpop.xlane.xlu0 %7983 }
0x11f2   :  { %v7988_v41 = vmul.f32 0.03125, %v7984_v2 }
0x11f3   :  { %v7991_v42 = vadd.f32 1e-05, %v7989_v30 }
0x11f4   :  { %v7990_v43 = vadd.f32 1e-05, %v7988_v41 }
0x11f5   :  { %9783 = vrsqrt.f32 %v7991_v42 }
0x11f6   :  { %9785 = vrsqrt.f32 %v7990_v43 }
0x11ff   :  { %v9784_v12 = vpop.eup %9783 }
0x1200   :  { %v9786_v53 = vpop.eup %9785  ;;  %v7995_v10 = vmul.f32 %v9784_v12, %v7979_v9 }
0x1201   :  { %v7994_v59 = vmul.f32 %v9786_v53, %v7978_v5 }
0x1202   :  { %v7997_v52 = vmul.f32 %v9826_v14, %v7995_v10 }
0x1203   :  { %v7996_v0 = vmul.f32 %v9826_v14, %v7994_v59 }
0x1204   :  { %v7999_v22 = vadd.f32 %v9827_v48, %v7997_v52 }
0x1205   :  { %v7998_v55 = vadd.f32 %v9827_v48, %v7996_v0 }
0x1206   :  { %8001 = vst.msk [vmem:[#allocation2 + $0x8] sm:$0xff] %vm254_vm1, %v7999_v22 }
0x1207   :  { %8000 = vst.msk [vmem:[#allocation2] sm:$0xff] %vm254_vm1, %v7998_v55 }
0x1208   :  { %9839 = shalt.err (!%p9836_p4)
}
0x1209   :  { %s9840_s11 = scalar_lea.hbm %s11435_s17, 256 }
0x120a   :  { %p9841_p5 = scmp.ne.s32.totalorder %s11435_s17, %s9840_s11  ;;  %p9844_p6 = scmp.lt.u32.totalorder %s9840_s11, %s11435_s17 }
0x120c   :  { %p9846_p7 = pnand %p9844_p6, %p9841_p5 }
0x120e   :  { %9849 = shalt.err (!%p9846_p7)
}
0x120f   :  { %s9856_s2 = smov 128   ;;  %s9857_s9 = smov 8  }
0x1210   :  { %8013 = dma.vmem_to_hbm [thread:$0]  %s8008_s20, 256, %s11435_s17, [#allocation3], %s9856_s2, %s9856_s2, %s9857_s9  }
0x1211   :  { %9850 = dma.done.wait [#allocation3], 256  }
0x1212   :  { %9851 = vsyncadd [#allocation3], 4294967040 }
0x1213   :  { %8017 = vsyncpa [#allocation3], 1 }

</bundles_post_ra>
